<compile_context>
chip_gen: v7x
topology: tpu7x:2x2x1
jax: 0.10.0
libtpu: 0.0.40
codegen_flags: <defaults>
</compile_context>

<pallas_src>
import functools

import jax
import jax.numpy as jnp
from jax import lax
from jax.experimental import pallas as pl
from jax.experimental.pallas import tpu as pltpu


def _cdiv(a, b):
    return (a + b - 1) // b


def _conv3x3_tap_kernel(x_cur_ref, x_halo_ref, w_ref, b_ref, o_ref, *, wp):
    """One (batch, N-tile) grid step.

    x_cur_ref : (Cin, Nt)        bf16  -- current flat-frame activation tile
    x_halo_ref: (Cin, halo_pad)  bf16  -- right halo (covers max tap offset 2*Wp+2)
    w_ref     : (9, Cout, Cin)   bf16  -- per-tap weights, t = ky*3 + kx
    b_ref     : (Cout, 1)        f32   -- bias
    o_ref     : (Cout, Nt)             -- output tile (lane axis = flat spatial, dense)
    """
    nt = o_ref.shape[-1]
    # Extended tile so every tap's Nt-wide slab is a static in-VMEM slice.
    x_ext = jnp.concatenate([x_cur_ref[...], x_halo_ref[...]], axis=-1)   # (Cin, Nt+halo)

    acc = jnp.zeros(o_ref.shape, jnp.float32)
    for t in range(9):                      # static unroll: 9 accumulated MXU matmuls
        ky, kx = divmod(t, 3)
        off = ky * wp + kx                  # static lane offset of this tap
        acc = acc + jnp.dot(w_ref[t], x_ext[:, off:off + nt],
                            preferred_element_type=jnp.float32)
    o_ref[...] = (acc + b_ref[...]).astype(o_ref.dtype)


def conv2d3_pallas(x, weight, bias, *, out_dtype=jnp.float32,
                   vmem_budget_bytes=40 << 20):
    """x: (B, Cin, H, W) f32 NCHW; weight: (Cout, Cin, 3, 3); bias: (Cout,).
    Equivalent to nn.Conv2d(Cin, Cout, kernel_size=3, stride=1, padding=1).
    Set out_dtype=jnp.bfloat16 to halve output HBM traffic if the consumer tolerates it.
    """
    B, Cin, H, W = x.shape
    Cout = weight.shape[0]

    # Flat-frame (shift-trick) geometry: padded row width Wp, output index q = y*Wp + x.
    Wp = W + 2
    Lq = H * Wp                       # flat output frame length (cols W..Wp-1 are scrap)
    halo = 2 * Wp + 2                 # max tap offset into the flat frame
    halo_pad = 128 * _cdiv(halo, 128)                     # lane-aligned halo block
    quantum = halo_pad if halo_pad % 256 == 0 else 2 * halo_pad   # Nt granule (>=256)

    # Pick Nt: largest multiple of `quantum` whose per-step working set fits the budget.
    per_lane = 16 * Cin + 12 * Cout                        # bytes per output lane (w/ margin)
    fixed = 36 * Cout * Cin + 4 * Cin * halo_pad + (4 << 20)
    nt_budget = max(quantum,
                    ((vmem_budget_bytes - fixed) // max(per_lane, 1)) // quantum * quantum)
    Nt = min(nt_budget, quantum * _cdiv(Lq, quantum))
    n_tiles = _cdiv(Lq, Nt)
    Lq_pad = n_tiles * Nt             # kernel output flat length (lane-dense tiles)
    Lin = Lq_pad + halo_pad           # activation flat length incl. trailing halo block

    # Activations: cast to bf16 BEFORE padding, pad H/W by 1, flatten, zero-fill tail.
    xb = x.astype(jnp.bfloat16)
    xp = jnp.pad(xb, ((0, 0), (0, 0), (1, 1), (1, 1)))            # (B, Cin, H+2, Wp)
    xflat = xp.reshape(B, Cin, (H + 2) * Wp)
    xflat = jnp.pad(xflat, ((0, 0), (0, 0), (0, Lin - (H + 2) * Wp)))   # (B, Cin, Lin)

    # Per-tap weights (9, Cout, Cin) bf16; bias (Cout, 1) f32.
    w9 = jnp.transpose(weight, (2, 3, 0, 1)).reshape(9, Cout, Cin).astype(jnp.bfloat16)
    b2 = bias.reshape(Cout, 1).astype(jnp.float32)

    kernel = functools.partial(_conv3x3_tap_kernel, wp=Wp)

    out_itemsize = jnp.dtype(out_dtype).itemsize
    flops = 2 * B * Cout * Cin * 9 * H * W
    bytes_accessed = (xflat.size * 2 + w9.size * 2 + b2.size * 4
                      + B * Cout * Lq_pad * out_itemsize)
    vmem_limit = min(max(vmem_budget_bytes + (8 << 20), 32 << 20), 56 << 20)

    def _run(single_buffer_consts):
        def const_spec(shape, imap):
            # Constant-index operands (weights/bias): request a single VMEM buffer.
            if single_buffer_consts:
                return pl.BlockSpec(shape, imap, pipeline_mode=pl.Buffered(1))
            return pl.BlockSpec(shape, imap)

        grid_spec = pltpu.PrefetchScalarGridSpec(
            num_scalar_prefetch=0,
            grid=(B, n_tiles),
            in_specs=[
                # Current activation tile (leading batch dim squeezed out of the ref).
                pl.BlockSpec((None, Cin, Nt), lambda b, j: (b, 0, j)),
                # Right halo: the first halo_pad lanes after this tile (auto-pipelined).
                pl.BlockSpec((None, Cin, halo_pad),
                             lambda b, j: (b, 0, (j + 1) * (Nt // halo_pad))),
                const_spec((9, Cout, Cin), lambda b, j: (0, 0, 0)),
                const_spec((Cout, 1), lambda b, j: (0, 0)),
            ],
            out_specs=pl.BlockSpec((None, Cout, Nt), lambda b, j: (b, 0, j)),
        )
        return pl.pallas_call(
            kernel,
            out_shape=jax.ShapeDtypeStruct((B, Cout, Lq_pad), out_dtype),
            grid_spec=grid_spec,
            compiler_params=pltpu.CompilerParams(
                dimension_semantics=("parallel", "parallel"),
                vmem_limit_bytes=vmem_limit,
            ),
            cost_estimate=pl.CostEstimate(flops=flops, transcendentals=0,
                                          bytes_accessed=bytes_accessed),
        )(xflat, xflat, w9, b2)

    try:
        y = _run(True)
    except Exception:
        y = _run(False)   # fall back if pipeline_mode=pl.Buffered(1) is unsupported

    # De-frame: drop flat tail padding and the Wp-W scrap columns per row.
    y = y[:, :, :Lq].reshape(B, Cout, H, Wp)[:, :, :, :W]
    return y


def reference(x, weight, bias):
    """Plain-JAX transcription of the PyTorch forward (exact f32 conv)."""
    out = lax.conv_general_dilated(
        x, weight, window_strides=(1, 1), padding=((1, 1), (1, 1)),
        dimension_numbers=('NCHW', 'OIHW', 'NCHW'))
    return out + bias[None, :, None, None]


if __name__ == "__main__":
    key = jax.random.PRNGKey(0)
    B, Cin, H, W = 2, 4, 16, 16
    Cout = 8
    k1, k2, k3 = jax.random.split(key, 3)

    x = jax.random.normal(k1, (B, Cin, H, W), jnp.float32)
    weight = jax.random.normal(k2, (Cout, Cin, 3, 3), jnp.float32) / jnp.sqrt(9.0 * Cin)
    bias = jax.random.normal(k3, (Cout,), jnp.float32) * 0.1

    y = jax.block_until_ready(conv2d3_pallas(x, weight, bias))
    y_ref = reference(x, weight, bias)

    assert y.shape == (B, Cout, H, W)
    # bf16 MXU operands with f32 accumulation -> tolerance loosened vs a pure-f32 check.
    assert jnp.allclose(y, y_ref, atol=5e-2, rtol=5e-2), "mismatch vs conv reference"
    print("KERNEL_OK")
</pallas_src>

<mosaic_0001>
module attributes {stable_mosaic.version = 11 : i64} {
  func.func @_conv3x3_tap_kernel(%arg0: i32, %arg1: i32, %arg2: memref<1x4x512xbf16, #tpu.memory_space<vmem>>, %arg3: memref<1x4x128xbf16, #tpu.memory_space<vmem>>, %arg4: memref<9x8x4xbf16, #tpu.memory_space<vmem>>, %arg5: memref<8x1xf32, #tpu.memory_space<vmem>>, %arg6: memref<1x8x512xf32, #tpu.memory_space<vmem>>) attributes {dimension_semantics = [#tpu.dimension_semantics<parallel>, #tpu.dimension_semantics<parallel>], iteration_bounds = array<i64: 2, 1>, scalar_prefetch = 0 : i64, scratch_operands = 0 : i64, tpu.core_type = #tpu.core_type<tc>, window_params = [{transform_indices = @transform_0, window_bounds = array<i64: 1, 4, 512>}, {transform_indices = @transform_1, window_bounds = array<i64: 1, 4, 128>}, {pipeline_mode = #tpu.pipeline_mode<synchronous>, transform_indices = @transform_2, window_bounds = array<i64: 9, 8, 4>}, {pipeline_mode = #tpu.pipeline_mode<synchronous>, transform_indices = @transform_3, window_bounds = array<i64: 8, 1>}, {transform_indices = @transform_4, window_bounds = array<i64: 1, 8, 512>}]} {
    %c0 = arith.constant 0 : index
    %c0_0 = arith.constant 0 : index
    %c0_1 = arith.constant 0 : index
    %0 = vector.load %arg2[%c0, %c0_0, %c0_1] : memref<1x4x512xbf16, #tpu.memory_space<vmem>>, vector<1x4x512xbf16>
    %1 = vector.shape_cast %0 : vector<1x4x512xbf16> to vector<4x512xbf16>
    %c0_2 = arith.constant 0 : index
    %c0_3 = arith.constant 0 : index
    %c0_4 = arith.constant 0 : index
    %2 = vector.load %arg3[%c0_2, %c0_3, %c0_4] : memref<1x4x128xbf16, #tpu.memory_space<vmem>>, vector<1x4x128xbf16>
    %3 = vector.shape_cast %2 : vector<1x4x128xbf16> to vector<4x128xbf16>
    %4 = tpu.concatenate %1, %3 in 1 : vector<4x512xbf16>, vector<4x128xbf16> -> vector<4x640xbf16>
    %cst = arith.constant 0.000000e+00 : f32
    %5 = vector.broadcast %cst : f32 to vector<8x512xf32>
    %c0_5 = arith.constant 0 : index
    %c0_6 = arith.constant 0 : index
    %c0_7 = arith.constant 0 : index
    %6 = vector.load %arg4[%c0_5, %c0_6, %c0_7] : memref<9x8x4xbf16, #tpu.memory_space<vmem>>, vector<1x8x4xbf16>
    %7 = vector.shape_cast %6 : vector<1x8x4xbf16> to vector<8x4xbf16>
    %8 = vector.extract_strided_slice %4 {offsets = [0, 0], sizes = [4, 512], strides = [1, 1]} : vector<4x640xbf16> to vector<4x512xbf16>
    %cst_8 = arith.constant dense<0.000000e+00> : vector<8x512xf32>
    %9 = tpu.matmul %7, %8, %cst_8 {dimension_numbers = #tpu.dot_dimension_numbers<[1], [0], [0], [1], [0, 0, 1, 1], [], []>} : vector<8x4xbf16>, vector<4x512xbf16>, vector<8x512xf32> -> vector<8x512xf32>
    %10 = arith.addf %5, %9 : vector<8x512xf32>
    %c1 = arith.constant 1 : index
    %c0_9 = arith.constant 0 : index
    %c0_10 = arith.constant 0 : index
    %11 = vector.load %arg4[%c1, %c0_9, %c0_10] : memref<9x8x4xbf16, #tpu.memory_space<vmem>>, vector<1x8x4xbf16>
    %12 = vector.shape_cast %11 : vector<1x8x4xbf16> to vector<8x4xbf16>
    %13 = vector.extract_strided_slice %4 {offsets = [0, 1], sizes = [4, 512], strides = [1, 1]} : vector<4x640xbf16> to vector<4x512xbf16>
    %cst_11 = arith.constant dense<0.000000e+00> : vector<8x512xf32>
    %14 = tpu.matmul %12, %13, %cst_11 {dimension_numbers = #tpu.dot_dimension_numbers<[1], [0], [0], [1], [0, 0, 1, 1], [], []>} : vector<8x4xbf16>, vector<4x512xbf16>, vector<8x512xf32> -> vector<8x512xf32>
    %15 = arith.addf %10, %14 : vector<8x512xf32>
    %c2 = arith.constant 2 : index
    %c0_12 = arith.constant 0 : index
    %c0_13 = arith.constant 0 : index
    %16 = vector.load %arg4[%c2, %c0_12, %c0_13] : memref<9x8x4xbf16, #tpu.memory_space<vmem>>, vector<1x8x4xbf16>
    %17 = vector.shape_cast %16 : vector<1x8x4xbf16> to vector<8x4xbf16>
    %18 = vector.extract_strided_slice %4 {offsets = [0, 2], sizes = [4, 512], strides = [1, 1]} : vector<4x640xbf16> to vector<4x512xbf16>
    %cst_14 = arith.constant dense<0.000000e+00> : vector<8x512xf32>
    %19 = tpu.matmul %17, %18, %cst_14 {dimension_numbers = #tpu.dot_dimension_numbers<[1], [0], [0], [1], [0, 0, 1, 1], [], []>} : vector<8x4xbf16>, vector<4x512xbf16>, vector<8x512xf32> -> vector<8x512xf32>
    %20 = arith.addf %15, %19 : vector<8x512xf32>
    %c3 = arith.constant 3 : index
    %c0_15 = arith.constant 0 : index
    %c0_16 = arith.constant 0 : index
    %21 = vector.load %arg4[%c3, %c0_15, %c0_16] : memref<9x8x4xbf16, #tpu.memory_space<vmem>>, vector<1x8x4xbf16>
    %22 = vector.shape_cast %21 : vector<1x8x4xbf16> to vector<8x4xbf16>
    %23 = vector.extract_strided_slice %4 {offsets = [0, 18], sizes = [4, 512], strides = [1, 1]} : vector<4x640xbf16> to vector<4x512xbf16>
    %cst_17 = arith.constant dense<0.000000e+00> : vector<8x512xf32>
    %24 = tpu.matmul %22, %23, %cst_17 {dimension_numbers = #tpu.dot_dimension_numbers<[1], [0], [0], [1], [0, 0, 1, 1], [], []>} : vector<8x4xbf16>, vector<4x512xbf16>, vector<8x512xf32> -> vector<8x512xf32>
    %25 = arith.addf %20, %24 : vector<8x512xf32>
    %c4 = arith.constant 4 : index
    %c0_18 = arith.constant 0 : index
    %c0_19 = arith.constant 0 : index
    %26 = vector.load %arg4[%c4, %c0_18, %c0_19] : memref<9x8x4xbf16, #tpu.memory_space<vmem>>, vector<1x8x4xbf16>
    %27 = vector.shape_cast %26 : vector<1x8x4xbf16> to vector<8x4xbf16>
    %28 = vector.extract_strided_slice %4 {offsets = [0, 19], sizes = [4, 512], strides = [1, 1]} : vector<4x640xbf16> to vector<4x512xbf16>
    %cst_20 = arith.constant dense<0.000000e+00> : vector<8x512xf32>
    %29 = tpu.matmul %27, %28, %cst_20 {dimension_numbers = #tpu.dot_dimension_numbers<[1], [0], [0], [1], [0, 0, 1, 1], [], []>} : vector<8x4xbf16>, vector<4x512xbf16>, vector<8x512xf32> -> vector<8x512xf32>
    %30 = arith.addf %25, %29 : vector<8x512xf32>
    %c5 = arith.constant 5 : index
    %c0_21 = arith.constant 0 : index
    %c0_22 = arith.constant 0 : index
    %31 = vector.load %arg4[%c5, %c0_21, %c0_22] : memref<9x8x4xbf16, #tpu.memory_space<vmem>>, vector<1x8x4xbf16>
    %32 = vector.shape_cast %31 : vector<1x8x4xbf16> to vector<8x4xbf16>
    %33 = vector.extract_strided_slice %4 {offsets = [0, 20], sizes = [4, 512], strides = [1, 1]} : vector<4x640xbf16> to vector<4x512xbf16>
    %cst_23 = arith.constant dense<0.000000e+00> : vector<8x512xf32>
    %34 = tpu.matmul %32, %33, %cst_23 {dimension_numbers = #tpu.dot_dimension_numbers<[1], [0], [0], [1], [0, 0, 1, 1], [], []>} : vector<8x4xbf16>, vector<4x512xbf16>, vector<8x512xf32> -> vector<8x512xf32>
    %35 = arith.addf %30, %34 : vector<8x512xf32>
    %c6 = arith.constant 6 : index
    %c0_24 = arith.constant 0 : index
    %c0_25 = arith.constant 0 : index
    %36 = vector.load %arg4[%c6, %c0_24, %c0_25] : memref<9x8x4xbf16, #tpu.memory_space<vmem>>, vector<1x8x4xbf16>
    %37 = vector.shape_cast %36 : vector<1x8x4xbf16> to vector<8x4xbf16>
    %38 = vector.extract_strided_slice %4 {offsets = [0, 36], sizes = [4, 512], strides = [1, 1]} : vector<4x640xbf16> to vector<4x512xbf16>
    %cst_26 = arith.constant dense<0.000000e+00> : vector<8x512xf32>
    %39 = tpu.matmul %37, %38, %cst_26 {dimension_numbers = #tpu.dot_dimension_numbers<[1], [0], [0], [1], [0, 0, 1, 1], [], []>} : vector<8x4xbf16>, vector<4x512xbf16>, vector<8x512xf32> -> vector<8x512xf32>
    %40 = arith.addf %35, %39 : vector<8x512xf32>
    %c7 = arith.constant 7 : index
    %c0_27 = arith.constant 0 : index
    %c0_28 = arith.constant 0 : index
    %41 = vector.load %arg4[%c7, %c0_27, %c0_28] : memref<9x8x4xbf16, #tpu.memory_space<vmem>>, vector<1x8x4xbf16>
    %42 = vector.shape_cast %41 : vector<1x8x4xbf16> to vector<8x4xbf16>
    %43 = vector.extract_strided_slice %4 {offsets = [0, 37], sizes = [4, 512], strides = [1, 1]} : vector<4x640xbf16> to vector<4x512xbf16>
    %cst_29 = arith.constant dense<0.000000e+00> : vector<8x512xf32>
    %44 = tpu.matmul %42, %43, %cst_29 {dimension_numbers = #tpu.dot_dimension_numbers<[1], [0], [0], [1], [0, 0, 1, 1], [], []>} : vector<8x4xbf16>, vector<4x512xbf16>, vector<8x512xf32> -> vector<8x512xf32>
    %45 = arith.addf %40, %44 : vector<8x512xf32>
    %c8 = arith.constant 8 : index
    %c0_30 = arith.constant 0 : index
    %c0_31 = arith.constant 0 : index
    %46 = vector.load %arg4[%c8, %c0_30, %c0_31] : memref<9x8x4xbf16, #tpu.memory_space<vmem>>, vector<1x8x4xbf16>
    %47 = vector.shape_cast %46 : vector<1x8x4xbf16> to vector<8x4xbf16>
    %48 = vector.extract_strided_slice %4 {offsets = [0, 38], sizes = [4, 512], strides = [1, 1]} : vector<4x640xbf16> to vector<4x512xbf16>
    %cst_32 = arith.constant dense<0.000000e+00> : vector<8x512xf32>
    %49 = tpu.matmul %47, %48, %cst_32 {dimension_numbers = #tpu.dot_dimension_numbers<[1], [0], [0], [1], [0, 0, 1, 1], [], []>} : vector<8x4xbf16>, vector<4x512xbf16>, vector<8x512xf32> -> vector<8x512xf32>
    %50 = arith.addf %45, %49 : vector<8x512xf32>
    %c0_33 = arith.constant 0 : index
    %c0_34 = arith.constant 0 : index
    %51 = vector.load %arg5[%c0_33, %c0_34] : memref<8x1xf32, #tpu.memory_space<vmem>>, vector<8x1xf32>
    %52 = vector.broadcast %51 : vector<8x1xf32> to vector<8x512xf32>
    %53 = arith.addf %50, %52 : vector<8x512xf32>
    %c0_35 = arith.constant 0 : index
    %c0_36 = arith.constant 0 : index
    %c0_37 = arith.constant 0 : index
    %54 = vector.load %arg6[%c0_35, %c0_36, %c0_37] : memref<1x8x512xf32, #tpu.memory_space<vmem>>, vector<1x8x512xf32>
    %55 = vector.shape_cast %54 : vector<1x8x512xf32> to vector<8x512xf32>
    %56 = vector.shape_cast %53 : vector<8x512xf32> to vector<1x8x512xf32>
    tpu.vector_store %arg6[%c0_35, %c0_36, %c0_37], %56 {strides = array<i32>} : memref<1x8x512xf32, #tpu.memory_space<vmem>>, vector<1x8x512xf32>,
    return
  }
  func.func @transform_0(%arg0: i32, %arg1: i32) -> (i32, i32, i32) {
    %c0_i32 = arith.constant 0 : i32
    %c0_i32_0 = arith.constant 0 : i32
    return %arg0, %c0_i32, %arg1 : i32, i32, i32
  }
  func.func @transform_1(%arg0: i32, %arg1: i32) -> (i32, i32, i32) {
    %c1_i32 = arith.constant 1 : i32
    %0 = arith.addi %arg1, %c1_i32 : i32
    %c4_i32 = arith.constant 4 : i32
    %1 = arith.muli %0, %c4_i32 : i32
    %c0_i32 = arith.constant 0 : i32
    %c0_i32_0 = arith.constant 0 : i32
    return %arg0, %c0_i32, %1 : i32, i32, i32
  }
  func.func @transform_2(%arg0: i32, %arg1: i32) -> (i32, i32, i32) {
    %c0_i32 = arith.constant 0 : i32
    %c0_i32_0 = arith.constant 0 : i32
    %c0_i32_1 = arith.constant 0 : i32
    %c0_i32_2 = arith.constant 0 : i32
    return %c0_i32, %c0_i32_0, %c0_i32_1 : i32, i32, i32
  }
  func.func @transform_3(%arg0: i32, %arg1: i32) -> (i32, i32) {
    %c0_i32 = arith.constant 0 : i32
    %c0_i32_0 = arith.constant 0 : i32
    %c0_i32_1 = arith.constant 0 : i32
    return %c0_i32, %c0_i32_0 : i32, i32
  }
  func.func @transform_4(%arg0: i32, %arg1: i32) -> (i32, i32, i32) {
    %c0_i32 = arith.constant 0 : i32
    %c0_i32_0 = arith.constant 0 : i32
    return %arg0, %c0_i32, %arg1 : i32, i32, i32
  }
}

module attributes {stable_mosaic.version = 11 : i64} {
  func.func @_conv3x3_tap_kernel(%arg0: i32, %arg1: i32, %arg2: memref<1x4x512xbf16, #tpu.memory_space<vmem>>, %arg3: memref<1x4x128xbf16, #tpu.memory_space<vmem>>, %arg4: memref<9x8x4xbf16, #tpu.memory_space<vmem>>, %arg5: memref<8x1xf32, #tpu.memory_space<vmem>>, %arg6: memref<1x8x512xf32, #tpu.memory_space<vmem>>) attributes {dimension_semantics = [#tpu.dimension_semantics<parallel>, #tpu.dimension_semantics<parallel>], iteration_bounds = array<i64: 2, 1>, scalar_prefetch = 0 : i64, scratch_operands = 0 : i64, tpu.core_type = #tpu.core_type<tc>, window_params = [{transform_indices = @transform_0, window_bounds = array<i64: 1, 4, 512>}, {transform_indices = @transform_1, window_bounds = array<i64: 1, 4, 128>}, {pipeline_mode = #tpu.pipeline_mode<synchronous>, transform_indices = @transform_2, window_bounds = array<i64: 9, 8, 4>}, {pipeline_mode = #tpu.pipeline_mode<synchronous>, transform_indices = @transform_3, window_bounds = array<i64: 8, 1>}, {transform_indices = @transform_4, window_bounds = array<i64: 1, 8, 512>}]} {
    %c0 = arith.constant 0 : index
    %c0_0 = arith.constant 0 : index
    %c0_1 = arith.constant 0 : index
    %0 = vector.load %arg2[%c0, %c0_0, %c0_1] : memref<1x4x512xbf16, #tpu.memory_space<vmem>>, vector<1x4x512xbf16>
    %1 = vector.shape_cast %0 : vector<1x4x512xbf16> to vector<4x512xbf16>
    %c0_2 = arith.constant 0 : index
    %c0_3 = arith.constant 0 : index
    %c0_4 = arith.constant 0 : index
    %2 = vector.load %arg3[%c0_2, %c0_3, %c0_4] : memref<1x4x128xbf16, #tpu.memory_space<vmem>>, vector<1x4x128xbf16>
    %3 = vector.shape_cast %2 : vector<1x4x128xbf16> to vector<4x128xbf16>
    %4 = tpu.concatenate %1, %3 in 1 : vector<4x512xbf16>, vector<4x128xbf16> -> vector<4x640xbf16>
    %cst = arith.constant 0.000000e+00 : f32
    %5 = vector.broadcast %cst : f32 to vector<8x512xf32>
    %c0_5 = arith.constant 0 : index
    %c0_6 = arith.constant 0 : index
    %c0_7 = arith.constant 0 : index
    %6 = vector.load %arg4[%c0_5, %c0_6, %c0_7] : memref<9x8x4xbf16, #tpu.memory_space<vmem>>, vector<1x8x4xbf16>
    %7 = vector.shape_cast %6 : vector<1x8x4xbf16> to vector<8x4xbf16>
    %8 = vector.extract_strided_slice %4 {offsets = [0, 0], sizes = [4, 512], strides = [1, 1]} : vector<4x640xbf16> to vector<4x512xbf16>
    %cst_8 = arith.constant dense<0.000000e+00> : vector<8x512xf32>
    %9 = tpu.matmul %7, %8, %cst_8 {dimension_numbers = #tpu.dot_dimension_numbers<[1], [0], [0], [1], [0, 0, 1, 1], [], []>} : vector<8x4xbf16>, vector<4x512xbf16>, vector<8x512xf32> -> vector<8x512xf32>
    %10 = arith.addf %5, %9 : vector<8x512xf32>
    %c1 = arith.constant 1 : index
    %c0_9 = arith.constant 0 : index
    %c0_10 = arith.constant 0 : index
    %11 = vector.load %arg4[%c1, %c0_9, %c0_10] : memref<9x8x4xbf16, #tpu.memory_space<vmem>>, vector<1x8x4xbf16>
    %12 = vector.shape_cast %11 : vector<1x8x4xbf16> to vector<8x4xbf16>
    %13 = vector.extract_strided_slice %4 {offsets = [0, 1], sizes = [4, 512], strides = [1, 1]} : vector<4x640xbf16> to vector<4x512xbf16>
    %cst_11 = arith.constant dense<0.000000e+00> : vector<8x512xf32>
    %14 = tpu.matmul %12, %13, %cst_11 {dimension_numbers = #tpu.dot_dimension_numbers<[1], [0], [0], [1], [0, 0, 1, 1], [], []>} : vector<8x4xbf16>, vector<4x512xbf16>, vector<8x512xf32> -> vector<8x512xf32>
    %15 = arith.addf %10, %14 : vector<8x512xf32>
    %c2 = arith.constant 2 : index
    %c0_12 = arith.constant 0 : index
    %c0_13 = arith.constant 0 : index
    %16 = vector.load %arg4[%c2, %c0_12, %c0_13] : memref<9x8x4xbf16, #tpu.memory_space<vmem>>, vector<1x8x4xbf16>
    %17 = vector.shape_cast %16 : vector<1x8x4xbf16> to vector<8x4xbf16>
    %18 = vector.extract_strided_slice %4 {offsets = [0, 2], sizes = [4, 512], strides = [1, 1]} : vector<4x640xbf16> to vector<4x512xbf16>
    %cst_14 = arith.constant dense<0.000000e+00> : vector<8x512xf32>
    %19 = tpu.matmul %17, %18, %cst_14 {dimension_numbers = #tpu.dot_dimension_numbers<[1], [0], [0], [1], [0, 0, 1, 1], [], []>} : vector<8x4xbf16>, vector<4x512xbf16>, vector<8x512xf32> -> vector<8x512xf32>
    %20 = arith.addf %15, %19 : vector<8x512xf32>
    %c3 = arith.constant 3 : index
    %c0_15 = arith.constant 0 : index
    %c0_16 = arith.constant 0 : index
    %21 = vector.load %arg4[%c3, %c0_15, %c0_16] : memref<9x8x4xbf16, #tpu.memory_space<vmem>>, vector<1x8x4xbf16>
    %22 = vector.shape_cast %21 : vector<1x8x4xbf16> to vector<8x4xbf16>
    %23 = vector.extract_strided_slice %4 {offsets = [0, 18], sizes = [4, 512], strides = [1, 1]} : vector<4x640xbf16> to vector<4x512xbf16>
    %cst_17 = arith.constant dense<0.000000e+00> : vector<8x512xf32>
    %24 = tpu.matmul %22, %23, %cst_17 {dimension_numbers = #tpu.dot_dimension_numbers<[1], [0], [0], [1], [0, 0, 1, 1], [], []>} : vector<8x4xbf16>, vector<4x512xbf16>, vector<8x512xf32> -> vector<8x512xf32>
    %25 = arith.addf %20, %24 : vector<8x512xf32>
    %c4 = arith.constant 4 : index
    %c0_18 = arith.constant 0 : index
    %c0_19 = arith.constant 0 : index
    %26 = vector.load %arg4[%c4, %c0_18, %c0_19] : memref<9x8x4xbf16, #tpu.memory_space<vmem>>, vector<1x8x4xbf16>
    %27 = vector.shape_cast %26 : vector<1x8x4xbf16> to vector<8x4xbf16>
    %28 = vector.extract_strided_slice %4 {offsets = [0, 19], sizes = [4, 512], strides = [1, 1]} : vector<4x640xbf16> to vector<4x512xbf16>
    %cst_20 = arith.constant dense<0.000000e+00> : vector<8x512xf32>
    %29 = tpu.matmul %27, %28, %cst_20 {dimension_numbers = #tpu.dot_dimension_numbers<[1], [0], [0], [1], [0, 0, 1, 1], [], []>} : vector<8x4xbf16>, vector<4x512xbf16>, vector<8x512xf32> -> vector<8x512xf32>
    %30 = arith.addf %25, %29 : vector<8x512xf32>
    %c5 = arith.constant 5 : index
    %c0_21 = arith.constant 0 : index
    %c0_22 = arith.constant 0 : index
    %31 = vector.load %arg4[%c5, %c0_21, %c0_22] : memref<9x8x4xbf16, #tpu.memory_space<vmem>>, vector<1x8x4xbf16>
    %32 = vector.shape_cast %31 : vector<1x8x4xbf16> to vector<8x4xbf16>
    %33 = vector.extract_strided_slice %4 {offsets = [0, 20], sizes = [4, 512], strides = [1, 1]} : vector<4x640xbf16> to vector<4x512xbf16>
    %cst_23 = arith.constant dense<0.000000e+00> : vector<8x512xf32>
    %34 = tpu.matmul %32, %33, %cst_23 {dimension_numbers = #tpu.dot_dimension_numbers<[1], [0], [0], [1], [0, 0, 1, 1], [], []>} : vector<8x4xbf16>, vector<4x512xbf16>, vector<8x512xf32> -> vector<8x512xf32>
    %35 = arith.addf %30, %34 : vector<8x512xf32>
    %c6 = arith.constant 6 : index
    %c0_24 = arith.constant 0 : index
    %c0_25 = arith.constant 0 : index
    %36 = vector.load %arg4[%c6, %c0_24, %c0_25] : memref<9x8x4xbf16, #tpu.memory_space<vmem>>, vector<1x8x4xbf16>
    %37 = vector.shape_cast %36 : vector<1x8x4xbf16> to vector<8x4xbf16>
    %38 = vector.extract_strided_slice %4 {offsets = [0, 36], sizes = [4, 512], strides = [1, 1]} : vector<4x640xbf16> to vector<4x512xbf16>
    %cst_26 = arith.constant dense<0.000000e+00> : vector<8x512xf32>
    %39 = tpu.matmul %37, %38, %cst_26 {dimension_numbers = #tpu.dot_dimension_numbers<[1], [0], [0], [1], [0, 0, 1, 1], [], []>} : vector<8x4xbf16>, vector<4x512xbf16>, vector<8x512xf32> -> vector<8x512xf32>
    %40 = arith.addf %35, %39 : vector<8x512xf32>
    %c7 = arith.constant 7 : index
    %c0_27 = arith.constant 0 : index
    %c0_28 = arith.constant 0 : index
    %41 = vector.load %arg4[%c7, %c0_27, %c0_28] : memref<9x8x4xbf16, #tpu.memory_space<vmem>>, vector<1x8x4xbf16>
    %42 = vector.shape_cast %41 : vector<1x8x4xbf16> to vector<8x4xbf16>
    %43 = vector.extract_strided_slice %4 {offsets = [0, 37], sizes = [4, 512], strides = [1, 1]} : vector<4x640xbf16> to vector<4x512xbf16>
    %cst_29 = arith.constant dense<0.000000e+00> : vector<8x512xf32>
    %44 = tpu.matmul %42, %43, %cst_29 {dimension_numbers = #tpu.dot_dimension_numbers<[1], [0], [0], [1], [0, 0, 1, 1], [], []>} : vector<8x4xbf16>, vector<4x512xbf16>, vector<8x512xf32> -> vector<8x512xf32>
    %45 = arith.addf %40, %44 : vector<8x512xf32>
    %c8 = arith.constant 8 : index
    %c0_30 = arith.constant 0 : index
    %c0_31 = arith.constant 0 : index
    %46 = vector.load %arg4[%c8, %c0_30, %c0_31] : memref<9x8x4xbf16, #tpu.memory_space<vmem>>, vector<1x8x4xbf16>
    %47 = vector.shape_cast %46 : vector<1x8x4xbf16> to vector<8x4xbf16>
    %48 = vector.extract_strided_slice %4 {offsets = [0, 38], sizes = [4, 512], strides = [1, 1]} : vector<4x640xbf16> to vector<4x512xbf16>
    %cst_32 = arith.constant dense<0.000000e+00> : vector<8x512xf32>
    %49 = tpu.matmul %47, %48, %cst_32 {dimension_numbers = #tpu.dot_dimension_numbers<[1], [0], [0], [1], [0, 0, 1, 1], [], []>} : vector<8x4xbf16>, vector<4x512xbf16>, vector<8x512xf32> -> vector<8x512xf32>
    %50 = arith.addf %45, %49 : vector<8x512xf32>
    %c0_33 = arith.constant 0 : index
    %c0_34 = arith.constant 0 : index
    %51 = vector.load %arg5[%c0_33, %c0_34] : memref<8x1xf32, #tpu.memory_space<vmem>>, vector<8x1xf32>
    %52 = vector.broadcast %51 : vector<8x1xf32> to vector<8x512xf32>
    %53 = arith.addf %50, %52 : vector<8x512xf32>
    %c0_35 = arith.constant 0 : index
    %c0_36 = arith.constant 0 : index
    %c0_37 = arith.constant 0 : index
    %54 = vector.load %arg6[%c0_35, %c0_36, %c0_37] : memref<1x8x512xf32, #tpu.memory_space<vmem>>, vector<1x8x512xf32>
    %55 = vector.shape_cast %54 : vector<1x8x512xf32> to vector<8x512xf32>
    %56 = vector.shape_cast %53 : vector<8x512xf32> to vector<1x8x512xf32>
    tpu.vector_store %arg6[%c0_35, %c0_36, %c0_37], %56 {strides = array<i32>} : memref<1x8x512xf32, #tpu.memory_space<vmem>>, vector<1x8x512xf32>,
    return
  }
  func.func @transform_0(%arg0: i32, %arg1: i32) -> (i32, i32, i32) {
    %c0_i32 = arith.constant 0 : i32
    %c0_i32_0 = arith.constant 0 : i32
    return %arg0, %c0_i32, %arg1 : i32, i32, i32
  }
  func.func @transform_1(%arg0: i32, %arg1: i32) -> (i32, i32, i32) {
    %c1_i32 = arith.constant 1 : i32
    %0 = arith.addi %arg1, %c1_i32 : i32
    %c4_i32 = arith.constant 4 : i32
    %1 = arith.muli %0, %c4_i32 : i32
    %c0_i32 = arith.constant 0 : i32
    %c0_i32_0 = arith.constant 0 : i32
    return %arg0, %c0_i32, %1 : i32, i32, i32
  }
  func.func @transform_2(%arg0: i32, %arg1: i32) -> (i32, i32, i32) {
    %c0_i32 = arith.constant 0 : i32
    %c0_i32_0 = arith.constant 0 : i32
    %c0_i32_1 = arith.constant 0 : i32
    %c0_i32_2 = arith.constant 0 : i32
    return %c0_i32, %c0_i32_0, %c0_i32_1 : i32, i32, i32
  }
  func.func @transform_3(%arg0: i32, %arg1: i32) -> (i32, i32) {
    %c0_i32 = arith.constant 0 : i32
    %c0_i32_0 = arith.constant 0 : i32
    %c0_i32_1 = arith.constant 0 : i32
    return %c0_i32, %c0_i32_0 : i32, i32
  }
  func.func @transform_4(%arg0: i32, %arg1: i32) -> (i32, i32, i32) {
    %c0_i32 = arith.constant 0 : i32
    %c0_i32_0 = arith.constant 0 : i32
    return %arg0, %c0_i32, %arg1 : i32, i32, i32
  }
}

</mosaic_0001>

<bundles_post_ra>
// kernel: tpu_custom_call.1
= control target key start
LH: loop header
LB: loop body
LE: loop exit
PB: predicated region body
PF: predicated region fallthrough
CT: control target
= control target key end

     0   :  { %9 = vsyncpa [#allocation3], 0  ;;  %s2027_s0 = inlined_call_operand.vmem [shape: bf16[2,4,640], index: 0, kind: input, shape index: {}]   ;;  %s2028_s1 = inlined_call_operand.vmem [shape: bf16[2,4,640], index: 1, kind: input, shape index: {}]   ;;  %s2029_s2 = inlined_call_operand.vmem [shape: bf16[9,8,4], index: 2, kind: input, shape index: {}]   ;;  %s2030_s3 = inlined_call_operand.vmem [shape: f32[8,1], index: 3, kind: input, shape index: {}]   ;;  %s2031_s4 = inlined_call_operand.hbm [shape: f32[2,8,512], index: 4, kind: output, shape index: {}]  }
   0x1   :  { %11 = vsyncpa [#allocation3 + $0x1], 0  ;;  %s1725_s15 = smov 0   ;;  %s1727_s16 = smov 0  }
   0x2   :  { %s1729_s17 = smov 0   ;;  %s1731_s18 = smov 0  }
   0x3   :  { %s1733_s19 = smov 0   ;;  %s1735_s20 = smov 0  }
   0x4 LB: > { %s1479_s21 = sadd.s32 4294967295, %s1687_s20   ;;  %s1480_s22 = sadd.s32 4294967294, %s1687_s20   ;;  %s1687_s20 = sphi %s1735_s20, %s17_s20   ;;  %s1683_s19 = sphi %s1733_s19, %s2038_s19   ;;  %s1679_s18 = sphi %s1731_s18, %s2037_s18   ;;  %s1675_s17 = sphi %s1729_s17, %s2036_s17   ;;  %s1671_s16 = sphi %s1727_s16, %s2035_s16   ;;  %s1667_s15 = sphi %s1725_s15, %s2034_s15  }
   0x5   : > { %s29_s23 = sadd.s32 1, %s1683_s19  ;;  %s140_s24 = sadd.s32 1, %s1675_s17 }
   0x6   : > { %p31_p0 = scmp.ge.s32.totalorder %s29_s23, 2  ;;  %p150_p1 = scmp.ne.s32.totalorder %s1675_s17, %s1671_s16 }
   0x7   : > { %p151_p2 = scmp.eq.s32.totalorder %s1479_s21, 1  ;;  %p156_p3 = scmp.ne.s32.totalorder %s1671_s16, %s1667_s15 }
   0x8   : > { %s2040_s23 = smov (%p31_p0, %s29_s23), 0  ;;  %p157_p5 = scmp.eq.s32.totalorder %s1480_s22, 1 }
   0x9   : > { %p1765_p4 = por %p151_p2, %p150_p1  ;;  %s135_s26 = ssub.s32 %s1683_s19, %s2040_s23 }
   0xa   : > { %p1483_p6 = scmp.ge.s32.totalorder %s1687_s20, 1  ;;  %p138_p7 = scmp.eq.s32.totalorder %s135_s26, 0 }
   0xb   : > { %p1772_p8 = por %p157_p5, %p156_p3  ;;  %p217_p9 = scmp.lt.s32.totalorder %s1687_s20, 3 }
   0xc   : > { %s1778_s28 = scalar_select %p138_p7, %s1675_s17, %s140_s24  }
   0xd   : > { %p218_p10 = pnand %p1483_p6, %p217_p9 }
   0xe   : > { %p266_p11 = scmp.lt.s32.totalorder (!%p218_p10), %s1679_s18, 1  ;;  %v300_v0 = vlaneseq (!%p218_p10)  ;;  %v1689_v1 = vmov (!%p218_p10), 1983009808   ;;  %v1690_v10 = vmov (!%p218_p10), 0   ;;  %s1691_s12 = smov (!%p218_p10), 127   ;;  %v1354_v14 = vld [vmem:[%s2030_s3] sm:$0xff] (!%p218_p10) }
   0xf   : > { %221 = sbr.rel (%p218_p10) target bundleno = 457 (0x1c9), region = 36  ;;  %v298_v2 = vunpack.c.l.s4 (!%p218_p10), %v1689_v1  ;;  %381 = vmatprep.mubr.bf16.mxu0 (!%p218_p10), %v1690_v10  ;;  %422 = vmatprep.mubr.bf16.mxu1 (!%p218_p10), %v1690_v10  ;;  %s1692_s13 = smov (!%p218_p10), 126   ;;  %vm327_vm0 = vcmask (!%p218_p10), 1039360   ;;  %vm336_vm1 = vcmask (!%p218_p10), 1041408   ;;  %v1487_v24 = vld [vmem:[%s2029_s2 + $0x4] sm:$0xf] (!%p218_p10) }
  0x10   : > { %v301_v3 = vshrl.u32 (!%p218_p10), %v300_v0, 7  ;;  %1607 = vset.pattern.permute.xlu0 (!%p218_p10), %v1690_v10  ;;  %s1693_s14 = smov (!%p218_p10), 110   ;;  %s1694_s21 = smov (!%p218_p10), 109   ;;  %vm332_vm2 = vcmask (!%p218_p10), 31744   ;;  %vm540_vm3 = vcmask (!%p218_p10), 1031168   ;;  %vm658_vm4 = vcmask (!%p218_p10), 900096  }
  0x11   : > { %v299_v4 = vunpack.c.0.s8 (!%p218_p10), %v298_v2  ;;  %s1695_s22 = smov (!%p218_p10), 108   ;;  %s1696_s24 = smov (!%p218_p10), 92   ;;  %v313_v36 = vld [vmem:[%s2029_s2] sm:$0xf] (!%p218_p10)  ;;  %v1496_v47 = vld [vmem:[%s2029_s2 + $0x8] sm:$0xf] (!%p218_p10) }
  0x12   : > { %s1697_s26 = smov (!%p218_p10), 91   ;;  %vm776_vm5 = vcmask (!%p218_p10), 891904   ;;  %v1501_v58 = vld [vmem:[%s2029_s2 + $0xc] sm:$0xf] (!%p218_p10)  ;;  %vm894_vm6 = vcmask (!%p218_p10), 883712   ;;  %vm1012_vm7 = vcmask (!%p218_p10), 752640  }
  0x13   : > { %v302_v5 = vsub.s32 (!%p218_p10), %v299_v4, %v301_v3  ;;  %v1506_v4 = vld [vmem:[%s2029_s2 + $0x10] sm:$0xf] (!%p218_p10)  ;;  %vm1130_vm8 = vcmask (!%p218_p10), 744448   ;;  %vm1248_vm9 = vcmask (!%p218_p10), 736256  }
  0x16   : > { %s267_s29 = scalar_select %p266_p11, %s1679_s18, 1 }
  0x18   : > { %s1539_s30 = smul.u32 10, %s267_s29  ;;  %s1698_s29 = smov 90  }
  0x1a   : > { %s1537_s5 = sadd.s32 8, %s1539_s30  ;;  %s273_s8 = scalar_lea.vmem %s2027_s0, %s1539_s30 }
  0x1b   : > { %s288_s11 = scalar_lea.vmem %s2028_s1, %s1537_s5  ;;  %v293_v6 = vld [vmem:[%s273_s8] sm:$0xff]  ;;  %s258_s8 = sand.u32 1, %s1671_s16  }
  0x1c   : > { %v294_v7 = vld [vmem:[%s288_s11] sm:$0x3]  ;;  %v296_v8 = vcombine.high %v293_v6, %v293_v6  ;;  %v1788_v9 = vrot.slane %v293_v6, %v302_v5  ;;  %s1484_s9 = sshll.u32 %s258_s8, 5  ;;  %s1538_s11 = sshll.u32 %s1679_s18, 9 }
  0x1d   : > { %325 = vrot.lane.b32.xlu0 %v294_v7, %s1691_s12  ;;  %s260_s10 = scalar_lea.vmem [#allocation2], %s1484_s9  ;;  %s1369_s18 = scalar_lea.sflag [#allocation3], %s258_s8 }
  0x1e   : > { %v1792_v11 = vrot.slane %v296_v8, %v302_v5  ;;  %530 = vrot.lane.b32.xlu1 %v1788_v9, %s1692_s13  ;;  %v1799_v12 = vcombine.high %v1788_v9, %v1788_v9  ;;  %v435_v26 = vsel %vm336_vm1, %v1788_v9, 0 }
  0x20   : > { %v1806_v13 = vcombine.high %v1792_v11, %v1792_v11  ;;  %v441_v34 = vsel %vm336_vm1, %v1792_v11, 0 }
  0x21   : > { %317 = vrot.lane.b32.xlu0 %v1788_v9, %s1691_s12 }
  0x22   : > { %321 = vrot.lane.b32.xlu1 %v1792_v11, %s1691_s12 }
  0x25   : > { %319 = vrot.lane.b32.xlu0 %v1799_v12, %s1691_s12 }
  0x26   : > { %534 = vrot.lane.b32.xlu1 %v1792_v11, %s1692_s13 }
  0x29   : > { %532 = vrot.lane.b32.xlu0 %v1799_v12, %s1692_s13 }
  0x2a   : > { %323 = vrot.lane.b32.xlu1 %v1806_v13, %s1691_s12  ;;  %s1385_s12 = sshll.u32 %s260_s10, 4  ;;  %s1980_s12 = int_to_ptr.vmem [resolvable:$true] %s1385_s12 }
  0x2d   : > { %536 = vrot.lane.b32.xlu0 %v1806_v13, %s1692_s13 }
  0x2e   : > { %538 = vrot.lane.b32.xlu1 %v294_v7, %s1692_s13 }
  0x31   : > { %648 = vrot.lane.b32.xlu0 %v1788_v9, %s1693_s14 }
  0x32   : > { %650 = vrot.lane.b32.xlu1 %v1799_v12, %s1693_s14 }
  0x35   : > { %652 = vrot.lane.b32.xlu0 %v1792_v11, %s1693_s14 }
  0x36   : > { %654 = vrot.lane.b32.xlu1 %v1806_v13, %s1693_s14 }
  0x39   : > { %656 = vrot.lane.b32.xlu0 %v294_v7, %s1693_s14 }
  0x3a   : > { %766 = vrot.lane.b32.xlu1 %v1788_v9, %s1694_s21 }
  0x3d   : > { %768 = vrot.lane.b32.xlu0 %v1799_v12, %s1694_s21 }
  0x3e   : > { %770 = vrot.lane.b32.xlu1 %v1792_v11, %s1694_s21 }
  0x41   : > { %772 = vrot.lane.b32.xlu0 %v1806_v13, %s1694_s21 }
  0x42   : > { %774 = vrot.lane.b32.xlu1 %v294_v7, %s1694_s21  ;;  %s1978_s21 = scalar_lea.hbm %s2031_s4, %s1538_s11 }
  0x45   : > { %884 = vrot.lane.b32.xlu0 %v1788_v9, %s1695_s22 }
  0x46   : > { %886 = vrot.lane.b32.xlu1 %v1799_v12, %s1695_s22 }
  0x49   : > { %888 = vrot.lane.b32.xlu0 %v1792_v11, %s1695_s22 }
  0x4a   : > { %890 = vrot.lane.b32.xlu1 %v1806_v13, %s1695_s22 }
  0x4d   : > { %892 = vrot.lane.b32.xlu0 %v294_v7, %s1695_s22  ;;  %s1609_s22 = scalar_lea.vmem %s1980_s12, 512 }
  0x4e   : > { %1002 = vrot.lane.b32.xlu1 %v1788_v9, %s1696_s24  ;;  %p1610_p12 = scmp.ne.s32.totalorder %s1980_s12, %s1609_s22 }
  0x50   : > { %p1611_p13 = pnand %p1610_p12, %p1765_p4 }
  0x51   : > { %1004 = vrot.lane.b32.xlu0 %v1799_v12, %s1696_s24 }
  0x52   : > { %1006 = vrot.lane.b32.xlu1 %v1792_v11, %s1696_s24  ;;  %p1612_p0 = pneg %p1611_p13 }
  0x55   : > { %1008 = vrot.lane.b32.xlu0 %v1806_v13, %s1696_s24 }
  0x56   : > { %1010 = vrot.lane.b32.xlu1 %v294_v7, %s1696_s24  ;;  %s1699_s24 = smov [#allocation2]  }
  0x59   : > { %1120 = vrot.lane.b32.xlu0 %v1788_v9, %s1697_s26 }
  0x5a   : > { %1122 = vrot.lane.b32.xlu1 %v1799_v12, %s1697_s26 }
  0x5d   : > { %1124 = vrot.lane.b32.xlu0 %v1792_v11, %s1697_s26 }
  0x5e   : > { %1126 = vrot.lane.b32.xlu1 %v1806_v13, %s1697_s26 }
  0x61   : > { %1128 = vrot.lane.b32.xlu0 %v294_v7, %s1697_s26  ;;  %s1613_s26 = sshll.u32 %s1699_s24, 4  ;;  %s1614_s26 = int_to_ptr.vmem [resolvable:$false] %s1613_s26 }
  0x62   : > { %1238 = vrot.lane.b32.xlu1 %v1788_v9, %s1698_s29  ;;  %p1616_p1 = scmp.lt.s32.totalorder %s1980_s12, %s1614_s26 }
  0x65   : > { %1240 = vrot.lane.b32.xlu0 %v1799_v12, %s1698_s29 }
  0x66   : > { %1242 = vrot.lane.b32.xlu1 %v1792_v11, %s1698_s29 }
  0x69   : > { %1244 = vrot.lane.b32.xlu0 %v1806_v13, %s1698_s29 }
  0x6a   : > { %1246 = vrot.lane.b32.xlu1 %v294_v7, %s1698_s29  ;;  %s1615_s29 = scalar_lea.vmem %s1614_s26, 1024 }
  0x6b   : > { %p1617_p2 = scmp.lt.s32.totalorder %s1615_s29, %s1609_s22 }
  0x6d   : > { %1357 = vperm.xlu0 %1607, %v1354_v14   ;;  %p1618_p3 = por %p1617_p2, %p1616_p1 }
  0x6f   : > { %p1619_p5 = pnand %p1618_p3, %p1612_p0 }
  0x8f   : > { %v326_v15 = vpop.permute.xlu0 %325 }
  0x90   : > { %v531_v16 = vpop.permute.xlu1 %530 }
  0x93   : > { %v318_v17 = vpop.permute.xlu0 %317 }
  0x94   : > { %v322_v18 = vpop.permute.xlu1 %321 }
  0x97   : > { %v320_v19 = vpop.permute.xlu0 %319 }
  0x98   : > { %v535_v20 = vpop.permute.xlu1 %534  ;;  %v329_v21 = vsel %vm327_vm0, %v320_v19, %v322_v18  ;;  %v328_v22 = vsel %vm327_vm0, %v318_v17, %v320_v19 }
  0x99   : > { %1488 = vmatprep.subr.msk.bf16.mxu0 %vm336_vm1, %v329_v21  ;;  %v338_v23 = vsel %vm336_vm1, %v328_v22, 0 }
  0x9a   : > { %350 = vmatpush1.bf16.msra.mxu0 %v338_v23 }
  0x9b   : > { %v533_v25 = vpop.permute.xlu0 %532  ;;  %1492 = vmatprep.subr.msk.bf16.mxu0 %vm336_vm1, %v1799_v12 }
  0x9c   : > { %v324_v27 = vpop.permute.xlu1 %323  ;;  %v542_v30 = vsel %vm540_vm3, %v533_v25, %v535_v20  ;;  %v541_v35 = vsel %vm540_vm3, %v531_v16, %v533_v25 }
  0x9d   : > { %1489 = vmatmul.mubr.msk.bf16.vlgmr.msra.gmra.mrb[0].mxu0 %vm332_vm2, %v1487_v24  ;;  %v331_v28 = vsel %vm327_vm0, %v324_v27, %v326_v15  ;;  %v330_v29 = vsel %vm327_vm0, %v322_v18, %v324_v27  ;;  %v549_v40 = vsel %vm336_vm1, %v541_v35, 0  ;;  %v1511_v15 = vld [vmem:[%s2029_s2 + $0x14] sm:$0xf]  ;;  %v1521_v35 = vld [vmem:[%s2029_s2 + $0x1c] sm:$0xf] }
  0x9e   : > { %1490 = vmatprep.subr.msk.bf16.mxu1 %vm336_vm1, %v331_v28  ;;  %447 = vmatpush1.bf16.msra.mxu0 %v435_v26  ;;  %v344_v31 = vsel %vm336_vm1, %v330_v29, 0  ;;  %v1516_v26 = vld [vmem:[%s2029_s2 + $0x18] sm:$0xf] }
  0x9f   : > { %1497 = vmatprep.subr.msk.bf16.mxu0 %vm336_vm1, %v542_v30  ;;  %v537_v32 = vpop.permute.xlu0 %536  ;;  %391 = vmatpush1.bf16.msra.mxu1 %v344_v31 }
  0xa0   : > { %v539_v33 = vpop.permute.xlu1 %538  ;;  %1494 = vmatprep.subr.msk.bf16.mxu1 %vm336_vm1, %v1806_v13  ;;  %478 = vmatprep.mubr.bf16.mxu0 %v1690_v10  ;;  %v543_v41 = vsel %vm540_vm3, %v535_v20, %v537_v32 }
  0xa1   : > { %v544_v37 = vsel %vm540_vm3, %v537_v32, %v539_v33  ;;  %v555_v45 = vsel %vm336_vm1, %v543_v41, 0 }
  0xa2   : > { %1491 = vmatmul.mubr.msk.bf16.vlgmr.msra.gmra.mrb[0].mxu1 %vm332_vm2, %v1487_v24 }
  0xa3   : > { %v649_v38 = vpop.permute.xlu0 %648  ;;  %488 = vmatpush1.bf16.msra.mxu1 %v441_v34  ;;  %519 = vmatprep.mubr.bf16.mxu1 %v1690_v10 }
  0xa4   : > { %1499 = vmatprep.subr.msk.bf16.mxu1 %vm336_vm1, %v544_v37  ;;  %v651_v39 = vpop.permute.xlu1 %650 }
  0xa5   : > { %1493 = vmatmul.mubr.msk.bf16.vlgmr.msra.gmra.mrb[4].mxu0 %vm332_vm2, %v313_v36  ;;  %v659_v46 = vsel %vm658_vm4, %v649_v38, %v651_v39 }
  0xa6   : > { %561 = vmatpush1.bf16.msra.mxu0 %v549_v40  ;;  %592 = vmatprep.mubr.bf16.mxu0 %v1690_v10  ;;  %v667_v51 = vsel %vm336_vm1, %v659_v46, 0  ;;  %v1526_v46 = vld [vmem:[%s2029_s2 + $0x20] sm:$0xf] }
  0xa7   : > { %v653_v42 = vpop.permute.xlu0 %652 }
  0xa8   : > { %v660_v43 = vsel %vm658_vm4, %v651_v39, %v653_v42  ;;  %v655_v44 = vpop.permute.xlu1 %654 }
  0xa9   : > { %1502 = vmatprep.subr.msk.bf16.mxu0 %vm336_vm1, %v660_v43  ;;  %v661_v52 = vsel %vm658_vm4, %v653_v42, %v655_v44 }
  0xaa   : > { %1495 = vmatmul.mubr.msk.bf16.vlgmr.msra.gmra.mrb[4].mxu1 %vm332_vm2, %v313_v36  ;;  %v673_v56 = vsel %vm336_vm1, %v661_v52, 0 }
  0xab   : > { %602 = vmatpush1.bf16.msra.mxu1 %v555_v45  ;;  %v657_v48 = vpop.permute.xlu0 %656  ;;  %633 = vmatprep.mubr.bf16.mxu1 %v1690_v10 }
  0xac   : > { %v662_v49 = vsel %vm658_vm4, %v655_v44, %v657_v48  ;;  %v767_v50 = vpop.permute.xlu1 %766 }
  0xad   : > { %1498 = vmatmul.mubr.msk.bf16.vlgmr.msra.gmra.mrb[8].mxu0 %vm332_vm2, %v1496_v47  ;;  %1504 = vmatprep.subr.msk.bf16.mxu1 %vm336_vm1, %v662_v49 }
  0xae   : > { %679 = vmatpush1.bf16.msra.mxu0 %v667_v51  ;;  %710 = vmatprep.mubr.bf16.mxu0 %v1690_v10 }
  0xaf   : > { %v769_v53 = vpop.permute.xlu0 %768 }
  0xb0   : > { %v771_v54 = vpop.permute.xlu1 %770  ;;  %v777_v57 = vsel %vm776_vm5, %v767_v50, %v769_v53 }
  0xb1   : > { %v778_v55 = vsel %vm776_vm5, %v769_v53, %v771_v54  ;;  %v785_v61 = vsel %vm336_vm1, %v777_v57, 0 }
  0xb2   : > { %1500 = vmatmul.mubr.msk.bf16.vlgmr.msra.gmra.mrb[8].mxu1 %vm332_vm2, %v1496_v47  ;;  %1507 = vmatprep.subr.msk.bf16.mxu0 %vm336_vm1, %v778_v55 }
  0xb3   : > { %720 = vmatpush1.bf16.msra.mxu1 %v673_v56  ;;  %v773_v59 = vpop.permute.xlu0 %772  ;;  %751 = vmatprep.mubr.bf16.mxu1 %v1690_v10 }
  0xb4   : > { %v775_v60 = vpop.permute.xlu1 %774  ;;  %v779_v63 = vsel %vm776_vm5, %v771_v54, %v773_v59 }
  0xb5   : > { %v780_v62 = vsel %vm776_vm5, %v773_v59, %v775_v60  ;;  %1503 = vmatmul.mubr.msk.bf16.vlgmr.msra.gmra.mrb[12].mxu0 %vm332_vm2, %v1501_v58  ;;  %v791_v2 = vsel %vm336_vm1, %v779_v63, 0 }
  0xb6   : > { %797 = vmatpush1.bf16.msra.mxu0 %v785_v61  ;;  %1509 = vmatprep.subr.msk.bf16.mxu1 %vm336_vm1, %v780_v62 }
  0xb7   : > { %v885_v0 = vpop.permute.xlu0 %884  ;;  %828 = vmatprep.mubr.bf16.mxu0 %v1690_v10 }
  0xb8   : > { %v887_v1 = vpop.permute.xlu1 %886 }
  0xb9   : > { %v895_v3 = vsel %vm894_vm6, %v885_v0, %v887_v1 }
  0xba   : > { %1505 = vmatmul.mubr.msk.bf16.vlgmr.msra.gmra.mrb[12].mxu1 %vm332_vm2, %v1501_v58  ;;  %v903_v8 = vsel %vm336_vm1, %v895_v3, 0 }
  0xbb   : > { %838 = vmatpush1.bf16.msra.mxu1 %v791_v2  ;;  %v889_v5 = vpop.permute.xlu0 %888  ;;  %869 = vmatprep.mubr.bf16.mxu1 %v1690_v10 }
  0xbc   : > { %v896_v6 = vsel %vm894_vm6, %v887_v1, %v889_v5  ;;  %v891_v7 = vpop.permute.xlu1 %890 }
  0xbd   : > { %1508 = vmatmul.mubr.msk.bf16.vlgmr.msra.gmra.mrb[16].mxu0 %vm332_vm2, %v1506_v4  ;;  %1512 = vmatprep.subr.msk.bf16.mxu0 %vm336_vm1, %v896_v6  ;;  %v897_v9 = vsel %vm894_vm6, %v889_v5, %v891_v7 }
  0xbe   : > { %915 = vmatpush1.bf16.msra.mxu0 %v903_v8  ;;  %946 = vmatprep.mubr.bf16.mxu0 %v1690_v10  ;;  %v909_v14 = vsel %vm336_vm1, %v897_v9, 0 }
  0xbf   : > { %v893_v11 = vpop.permute.xlu0 %892 }
  0xc0   : > { %v898_v12 = vsel %vm894_vm6, %v891_v7, %v893_v11  ;;  %v1003_v13 = vpop.permute.xlu1 %1002 }
  0xc1   : > { %1514 = vmatprep.subr.msk.bf16.mxu1 %vm336_vm1, %v898_v12 }
  0xc2   : > { %1510 = vmatmul.mubr.msk.bf16.vlgmr.msra.gmra.mrb[16].mxu1 %vm332_vm2, %v1506_v4 }
  0xc3   : > { %956 = vmatpush1.bf16.msra.mxu1 %v909_v14  ;;  %v1005_v16 = vpop.permute.xlu0 %1004  ;;  %987 = vmatprep.mubr.bf16.mxu1 %v1690_v10 }
  0xc4   : > { %v1013_v17 = vsel %vm1012_vm7, %v1003_v13, %v1005_v16  ;;  %v1007_v18 = vpop.permute.xlu1 %1006 }
  0xc5   : > { %v1021_v19 = vsel %vm336_vm1, %v1013_v17, 0  ;;  %v1014_v20 = vsel %vm1012_vm7, %v1005_v16, %v1007_v18  ;;  %1513 = vmatmul.mubr.msk.bf16.vlgmr.msra.gmra.mrb[20].mxu0 %vm332_vm2, %v1511_v15 }
  0xc6   : > { %1517 = vmatprep.subr.msk.bf16.mxu0 %vm336_vm1, %v1014_v20  ;;  %1064 = vmatprep.mubr.bf16.mxu0 %v1690_v10 }
  0xc7   : > { %v1009_v21 = vpop.permute.xlu0 %1008  ;;  %1033 = vmatpush1.bf16.msra.mxu0 %v1021_v19 }
  0xc8   : > { %v1015_v22 = vsel %vm1012_vm7, %v1007_v18, %v1009_v21  ;;  %v1011_v23 = vpop.permute.xlu1 %1010 }
  0xc9   : > { %v1027_v24 = vsel %vm336_vm1, %v1015_v22, 0  ;;  %v1016_v25 = vsel %vm1012_vm7, %v1009_v21, %v1011_v23 }
  0xca   : > { %1515 = vmatmul.mubr.msk.bf16.vlgmr.msra.gmra.mrb[20].mxu1 %vm332_vm2, %v1511_v15  ;;  %1519 = vmatprep.subr.msk.bf16.mxu1 %vm336_vm1, %v1016_v25 }
  0xcb   : > { %v1121_v27 = vpop.permute.xlu0 %1120  ;;  %1074 = vmatpush1.bf16.msra.mxu1 %v1027_v24  ;;  %1105 = vmatprep.mubr.bf16.mxu1 %v1690_v10 }
  0xcc   : > { %v1123_v28 = vpop.permute.xlu1 %1122 }
  0xcd   : > { %1518 = vmatmul.mubr.msk.bf16.vlgmr.msra.gmra.mrb[24].mxu0 %vm332_vm2, %v1516_v26  ;;  %v1131_v29 = vsel %vm1130_vm8, %v1121_v27, %v1123_v28 }
  0xce   : > { %1182 = vmatprep.mubr.bf16.mxu0 %v1690_v10  ;;  %v1139_v33 = vsel %vm336_vm1, %v1131_v29, 0 }
  0xcf   : > { %v1125_v30 = vpop.permute.xlu0 %1124 }
  0xd0   : > { %v1132_v31 = vsel %vm1130_vm8, %v1123_v28, %v1125_v30  ;;  %v1127_v32 = vpop.permute.xlu1 %1126 }
  0xd1   : > { %1522 = vmatprep.subr.msk.bf16.mxu0 %vm336_vm1, %v1132_v31  ;;  %v1133_v34 = vsel %vm1130_vm8, %v1125_v30, %v1127_v32 }
  0xd2   : > { %1520 = vmatmul.mubr.msk.bf16.vlgmr.msra.gmra.mrb[24].mxu1 %vm332_vm2, %v1516_v26  ;;  %1151 = vmatpush1.bf16.msra.mxu0 %v1139_v33  ;;  %v1145_v39 = vsel %vm336_vm1, %v1133_v34, 0 }
  0xd3   : > { %v1129_v36 = vpop.permute.xlu0 %1128  ;;  %1223 = vmatprep.mubr.bf16.mxu1 %v1690_v10 }
  0xd4   : > { %v1134_v37 = vsel %vm1130_vm8, %v1127_v32, %v1129_v36  ;;  %v1239_v38 = vpop.permute.xlu1 %1238 }
  0xd5   : > { %1523 = vmatmul.mubr.msk.bf16.vlgmr.msra.gmra.mrb[28].mxu0 %vm332_vm2, %v1521_v35  ;;  %1524 = vmatprep.subr.msk.bf16.mxu1 %vm336_vm1, %v1134_v37 }
  0xd6   : > { %1192 = vmatpush1.bf16.msra.mxu1 %v1145_v39  ;;  %1300 = vmatprep.mubr.bf16.mxu0 %v1690_v10 }
  0xd7   : > { %v1241_v40 = vpop.permute.xlu0 %1240 }
  0xd8   : > { %v1249_v41 = vsel %vm1248_vm9, %v1239_v38, %v1241_v40  ;;  %v1243_v42 = vpop.permute.xlu1 %1242 }
  0xd9   : > { %v1257_v43 = vsel %vm336_vm1, %v1249_v41, 0  ;;  %v1250_v44 = vsel %vm1248_vm9, %v1241_v40, %v1243_v42 }
  0xda   : > { %1525 = vmatmul.mubr.msk.bf16.vlgmr.msra.gmra.mrb[28].mxu1 %vm332_vm2, %v1521_v35  ;;  %1527 = vmatprep.subr.msk.bf16.mxu0 %vm336_vm1, %v1250_v44 }
  0xdb   : > { %v1245_v45 = vpop.permute.xlu0 %1244  ;;  %1269 = vmatpush1.bf16.msra.mxu0 %v1257_v43  ;;  %1341 = vmatprep.mubr.bf16.mxu1 %v1690_v10 }
  0xdc   : > { %v1251_v47 = vsel %vm1248_vm9, %v1243_v42, %v1245_v45  ;;  %v1247_v48 = vpop.permute.xlu1 %1246 }
  0xdd   : > { %v1263_v49 = vsel %vm336_vm1, %v1251_v47, 0  ;;  %v1252_v50 = vsel %vm1248_vm9, %v1245_v45, %v1247_v48 }
  0xde   : > { %1528 = vmatmul.mubr.msk.bf16.vlgmr.msra.gmra.mrb[32].mxu0 %vm332_vm2, %v1526_v46  ;;  %1529 = vmatprep.subr.msk.bf16.mxu1 %vm336_vm1, %v1252_v50 }
  0xdf   : > { %1310 = vmatpush1.bf16.msra.mxu1 %v1263_v49 }
  0xe2   : > { %1530 = vmatmul.mubr.msk.bf16.vlgmr.msra.gmra.mrb[32].mxu1 %vm332_vm2, %v1526_v46 }
 0x170   : > { %v383_v51 = vpop.f32.mrb[0].mxu0 }
 0x171   : > { %v385_v52 = vpop.f32.mrb[1].mxu0 }
 0x172   : > { %v387_v53 = vpop.f32.mrb[2].mxu0 }
 0x173   : > { %v388_v54 = vpop.f32.mrb[3].mxu0 }
 0x175   : > { %v424_v55 = vpop.f32.mrb[0].mxu1 }
 0x176   : > { %v426_v10 = vpop.f32.mrb[1].mxu1 }
 0x177   : > { %v428_v56 = vpop.f32.mrb[2].mxu1 }
 0x178   : > { %v480_v57 = vpop.f32.mrb[4].mxu0  ;;  %v429_v58 = vpop.f32.mrb[3].mxu1 }
 0x179   : > { %v481_v59 = vadd.f32 %v480_v57, %v383_v51  ;;  %v482_v60 = vpop.f32.mrb[5].mxu0 }
 0x17a   : > { %v483_v61 = vadd.f32 %v482_v60, %v385_v52  ;;  %v484_v62 = vpop.f32.mrb[6].mxu0 }
 0x17b   : > { %v485_v63 = vpop.f32.mrb[7].mxu0 }
 0x17d   : > { %v521_v0 = vpop.f32.mrb[4].mxu1 }
 0x17e   : > { %v522_v1 = vadd.f32 %v521_v0, %v424_v55  ;;  %v523_v2 = vpop.f32.mrb[5].mxu1 }
 0x17f   : > { %v524_v3 = vadd.f32 %v523_v2, %v426_v10  ;;  %v525_v4 = vpop.f32.mrb[6].mxu1 }
 0x180   : > { %v594_v5 = vpop.f32.mrb[8].mxu0  ;;  %v526_v6 = vpop.f32.mrb[7].mxu1 }
 0x181   : > { %v642_v7 = vadd.f32 %v594_v5, %v481_v59  ;;  %v596_v8 = vpop.f32.mrb[9].mxu0 }
 0x182   : > { %v643_v9 = vadd.f32 %v596_v8, %v483_v61  ;;  %v598_v11 = vpop.f32.mrb[10].mxu0 }
 0x183   : > { %v599_v12 = vpop.f32.mrb[11].mxu0 }
 0x185   : > { %v635_v13 = vpop.f32.mrb[8].mxu1 }
 0x186   : > { %v644_v14 = vadd.f32 %v635_v13, %v522_v1  ;;  %v637_v15 = vpop.f32.mrb[9].mxu1 }
 0x187   : > { %v645_v16 = vadd.f32 %v637_v15, %v524_v3  ;;  %v639_v17 = vpop.f32.mrb[10].mxu1 }
 0x188   : > { %v712_v18 = vpop.f32.mrb[12].mxu0  ;;  %v640_v19 = vpop.f32.mrb[11].mxu1 }
 0x189   : > { %v760_v20 = vadd.f32 %v712_v18, %v642_v7  ;;  %v714_v21 = vpop.f32.mrb[13].mxu0 }
 0x18a   : > { %v761_v22 = vadd.f32 %v714_v21, %v643_v9  ;;  %v716_v23 = vpop.f32.mrb[14].mxu0 }
 0x18b   : > { %v717_v24 = vpop.f32.mrb[15].mxu0 }
 0x18d   : > { %v753_v25 = vpop.f32.mrb[12].mxu1 }
 0x18e   : > { %v762_v26 = vadd.f32 %v753_v25, %v644_v14  ;;  %v755_v27 = vpop.f32.mrb[13].mxu1 }
 0x18f   : > { %v763_v28 = vadd.f32 %v755_v27, %v645_v16  ;;  %v757_v29 = vpop.f32.mrb[14].mxu1  ;;  %v1358_v16 = vpop.permute.xlu0 %1357 }
 0x190   : > { %v830_v30 = vpop.f32.mrb[16].mxu0  ;;  %v758_v31 = vpop.f32.mrb[15].mxu1 }
 0x191   : > { %v878_v32 = vadd.f32 %v830_v30, %v760_v20  ;;  %v832_v33 = vpop.f32.mrb[17].mxu0 }
 0x192   : > { %v879_v34 = vadd.f32 %v832_v33, %v761_v22  ;;  %v834_v35 = vpop.f32.mrb[18].mxu0 }
 0x193   : > { %v835_v36 = vpop.f32.mrb[19].mxu0 }
 0x195   : > { %v871_v37 = vpop.f32.mrb[16].mxu1 }
 0x196   : > { %v880_v38 = vadd.f32 %v871_v37, %v762_v26  ;;  %v873_v39 = vpop.f32.mrb[17].mxu1 }
 0x197   : > { %v881_v40 = vadd.f32 %v873_v39, %v763_v28  ;;  %v875_v41 = vpop.f32.mrb[18].mxu1 }
 0x198   : > { %v948_v42 = vpop.f32.mrb[20].mxu0  ;;  %v876_v43 = vpop.f32.mrb[19].mxu1 }
 0x199   : > { %v996_v44 = vadd.f32 %v948_v42, %v878_v32  ;;  %v950_v45 = vpop.f32.mrb[21].mxu0 }
 0x19a   : > { %v997_v46 = vadd.f32 %v950_v45, %v879_v34  ;;  %v952_v47 = vpop.f32.mrb[22].mxu0 }
 0x19b   : > { %v953_v48 = vpop.f32.mrb[23].mxu0 }
 0x19d   : > { %v989_v49 = vpop.f32.mrb[20].mxu1 }
 0x19e   : > { %v998_v50 = vadd.f32 %v989_v49, %v880_v38  ;;  %v991_v51 = vpop.f32.mrb[21].mxu1 }
 0x19f   : > { %v999_v52 = vadd.f32 %v991_v51, %v881_v40  ;;  %v993_v53 = vpop.f32.mrb[22].mxu1 }
 0x1a0   : > { %v1066_v54 = vpop.f32.mrb[24].mxu0  ;;  %v994_v55 = vpop.f32.mrb[23].mxu1 }
 0x1a1   : > { %v1114_v10 = vadd.f32 %v1066_v54, %v996_v44  ;;  %v1068_v56 = vpop.f32.mrb[25].mxu0 }
 0x1a2   : > { %v1115_v57 = vadd.f32 %v1068_v56, %v997_v46  ;;  %v1070_v58 = vpop.f32.mrb[26].mxu0 }
 0x1a3   : > { %v1071_v59 = vpop.f32.mrb[27].mxu0 }
 0x1a5   : > { %v1107_v60 = vpop.f32.mrb[24].mxu1 }
 0x1a6   : > { %v1116_v61 = vadd.f32 %v1107_v60, %v998_v50  ;;  %v1109_v62 = vpop.f32.mrb[25].mxu1 }
 0x1a7   : > { %v1117_v63 = vadd.f32 %v1109_v62, %v999_v52  ;;  %v1111_v0 = vpop.f32.mrb[26].mxu1 }
 0x1a8   : > { %v1184_v1 = vpop.f32.mrb[28].mxu0  ;;  %v1112_v2 = vpop.f32.mrb[27].mxu1 }
 0x1a9   : > { %v1232_v3 = vadd.f32 %v1184_v1, %v1114_v10  ;;  %v1186_v4 = vpop.f32.mrb[29].mxu0 }
 0x1aa   : > { %v1233_v5 = vadd.f32 %v1186_v4, %v1115_v57  ;;  %v1188_v6 = vpop.f32.mrb[30].mxu0 }
 0x1ab   : > { %v1189_v7 = vpop.f32.mrb[31].mxu0 }
 0x1ad   : > { %v1225_v8 = vpop.f32.mrb[28].mxu1 }
 0x1ae   : > { %v1234_v9 = vadd.f32 %v1225_v8, %v1116_v61  ;;  %v1227_v11 = vpop.f32.mrb[29].mxu1 }
 0x1af   : > { %v1235_v12 = vadd.f32 %v1227_v11, %v1117_v63  ;;  %v1229_v13 = vpop.f32.mrb[30].mxu1 }
 0x1b0   : > { %v1230_v14 = vpop.f32.mrb[31].mxu1 }
 0x1b1   : > { %v1302_v15 = vpop.f32.mrb[32].mxu0 }
 0x1b2   : > { %v1350_v17 = vadd.f32 %v1302_v15, %v1232_v3  ;;  %v1304_v18 = vpop.f32.mrb[33].mxu0 }
 0x1b3   : > { %v1351_v19 = vadd.f32 %v1304_v18, %v1233_v5  ;;  %v1306_v20 = vpop.f32.mrb[34].mxu0 }
 0x1b4   : > { %v1360_v21 = vadd.f32 %v1358_v16, %v1350_v17  ;;  %v1307_v22 = vpop.f32.mrb[35].mxu0 }
 0x1b5   : > { %v1361_v23 = vadd.f32 %v1358_v16, %v1351_v19  ;;  %v1343_v24 = vpop.f32.mrb[32].mxu1 }
 0x1b6   : > { %1364 = vst [vmem:[%s260_s10] sm:$0xff] %v1360_v21  ;;  %v1352_v25 = vadd.f32 %v1343_v24, %v1234_v9  ;;  %v1345_v26 = vpop.f32.mrb[33].mxu1 }
 0x1b7   : > { %1365 = vst [vmem:[%s260_s10 + $0x8] sm:$0xff] %v1361_v23  ;;  %v1353_v27 = vadd.f32 %v1345_v26, %v1235_v12  ;;  %v1347_v28 = vpop.f32.mrb[34].mxu1 }
 0x1b8   : > { %v1362_v29 = vadd.f32 %v1358_v16, %v1352_v25  ;;  %v1348_v30 = vpop.f32.mrb[35].mxu1 }
 0x1b9   : > { %v1363_v31 = vadd.f32 %v1358_v16, %v1353_v27 }
 0x1ba   : > { %1366 = vst [vmem:[%s260_s10 + $0x10] sm:$0xff] %v1362_v29 }
 0x1bb   : > { %1367 = vst [vmem:[%s260_s10 + $0x18] sm:$0xff] %v1363_v31 }
 0x1bc   : > { %1622 = shalt.err (!%p1619_p5)
}
 0x1bd   : > { %s1623_s30 = scalar_lea.hbm %s1978_s21, 512  ;;  %s1627_s7 = scalar_lea.hbm %s2031_s4, 1024 }
 0x1be   : > { %p1624_p6 = scmp.ne.s32.totalorder %s1978_s21, %s1623_s30  ;;  %p1628_p10 = scmp.lt.u32.totalorder %s1978_s21, %s2031_s4 }
 0x1bf   : > { %p1629_p11 = scmp.lt.u32.totalorder %s1627_s7, %s1623_s30  ;;  %p1631_p13 = scmp.lt.u32.totalorder %s1623_s30, %s1978_s21 }
 0x1c0   : > { %p1625_p7 = pnand %p1624_p6, %p1765_p4 }
 0x1c1   : > { %p1630_p12 = por %p1629_p11, %p1628_p10 }
 0x1c2   : > { %p1626_p9 = pneg %p1625_p7 }
 0x1c3   : > { %p1632_p0 = por %p1631_p13, %p1630_p12 }
 0x1c5   : > { %p1633_p1 = pnand %p1632_p0, %p1626_p9 }
 0x1c7   : > { %1636 = shalt.err (!%p1633_p1)
}
 0x1c8   : > { %1541 = dma.vmem_to_hbm [thread:$0]  (%p1765_p4), %s1980_s12, 512, %s1978_s21, %s1369_s18  }
 0x1c9 PF: > { %p1548_p2 = scmp.ge.s32.totalorder %s1687_s20, 2  ;;  %s1397_s10 = sand.u32 1, %s1667_s15  }
 0x1ca   : > { %s1398_s11 = scalar_lea.sflag [#allocation3], %s1397_s10 }
 0x1cb   : > { %p1544_p3 = pnand %p1548_p2, %p1772_p8 }
 0x1cd   : > { %1662 = dma.done.wait (!%p1544_p3), %s1398_s11, 512  }
 0x1ce   : > { %1664 = vsyncadd (!%p1544_p3), %s1398_s11, 4294966784  ;;  %s17_s20 = sadd.s32 1, %s1687_s20   ;;  %s2034_s15 = smov %s1671_s16 }
 0x1cf   : > { %p14_p5 = scmp.ge.s32.totalorder %s17_s20, 4   ;;  %s2035_s16 = smov %s1675_s17 }
 0x1d0   : > { %s2036_s17 = smov %s1778_s28  ;;  %s2037_s18 = smov %s1683_s19 }
 0x1d1   : > { %s2038_s19 = smov %s2040_s23  ;;  %16 = sbr.rel (!%p14_p5) target bundleno = 4 (0x4), region = 82 }
 0x1d8   :  { %1403 = vsyncpa [#allocation3], 1 }
 0x1d9   :  { %1405 = vsyncpa [#allocation3 + $0x1], 1 }

// kernel: tpu_custom_call.1
= control target key start
LH: loop header
LB: loop body
LE: loop exit
PB: predicated region body
PF: predicated region fallthrough
CT: control target
= control target key end

     0   :  { %9 = vsyncpa [#allocation3], 0  ;;  %s2027_s0 = inlined_call_operand.vmem [shape: bf16[2,4,640], index: 0, kind: input, shape index: {}]   ;;  %s2028_s1 = inlined_call_operand.vmem [shape: bf16[2,4,640], index: 1, kind: input, shape index: {}]   ;;  %s2029_s2 = inlined_call_operand.vmem [shape: bf16[9,8,4], index: 2, kind: input, shape index: {}]   ;;  %s2030_s3 = inlined_call_operand.vmem [shape: f32[8,1], index: 3, kind: input, shape index: {}]   ;;  %s2031_s4 = inlined_call_operand.hbm [shape: f32[2,8,512], index: 4, kind: output, shape index: {}]  }
   0x1   :  { %11 = vsyncpa [#allocation3 + $0x1], 0  ;;  %s1725_s15 = smov 0   ;;  %s1727_s16 = smov 0  }
   0x2   :  { %s1729_s17 = smov 0   ;;  %s1731_s18 = smov 0  }
   0x3   :  { %s1733_s19 = smov 0   ;;  %s1735_s20 = smov 0  }
   0x4 LB: > { %s1479_s21 = sadd.s32 4294967295, %s1687_s20   ;;  %s1480_s22 = sadd.s32 4294967294, %s1687_s20   ;;  %s1687_s20 = sphi %s1735_s20, %s17_s20   ;;  %s1683_s19 = sphi %s1733_s19, %s2038_s19   ;;  %s1679_s18 = sphi %s1731_s18, %s2037_s18   ;;  %s1675_s17 = sphi %s1729_s17, %s2036_s17   ;;  %s1671_s16 = sphi %s1727_s16, %s2035_s16   ;;  %s1667_s15 = sphi %s1725_s15, %s2034_s15  }
   0x5   : > { %s29_s23 = sadd.s32 1, %s1683_s19  ;;  %s140_s24 = sadd.s32 1, %s1675_s17 }
   0x6   : > { %p31_p0 = scmp.ge.s32.totalorder %s29_s23, 2  ;;  %p150_p1 = scmp.ne.s32.totalorder %s1675_s17, %s1671_s16 }
   0x7   : > { %p151_p2 = scmp.eq.s32.totalorder %s1479_s21, 1  ;;  %p156_p3 = scmp.ne.s32.totalorder %s1671_s16, %s1667_s15 }
   0x8   : > { %s2040_s23 = smov (%p31_p0, %s29_s23), 0  ;;  %p157_p5 = scmp.eq.s32.totalorder %s1480_s22, 1 }
   0x9   : > { %p1765_p4 = por %p151_p2, %p150_p1  ;;  %s135_s26 = ssub.s32 %s1683_s19, %s2040_s23 }
   0xa   : > { %p1483_p6 = scmp.ge.s32.totalorder %s1687_s20, 1  ;;  %p138_p7 = scmp.eq.s32.totalorder %s135_s26, 0 }
   0xb   : > { %p1772_p8 = por %p157_p5, %p156_p3  ;;  %p217_p9 = scmp.lt.s32.totalorder %s1687_s20, 3 }
   0xc   : > { %s1778_s28 = scalar_select %p138_p7, %s1675_s17, %s140_s24  }
   0xd   : > { %p218_p10 = pnand %p1483_p6, %p217_p9 }
   0xe   : > { %p266_p11 = scmp.lt.s32.totalorder (!%p218_p10), %s1679_s18, 1  ;;  %v300_v0 = vlaneseq (!%p218_p10)  ;;  %v1689_v1 = vmov (!%p218_p10), 1983009808   ;;  %v1690_v10 = vmov (!%p218_p10), 0   ;;  %s1691_s12 = smov (!%p218_p10), 127   ;;  %v1354_v14 = vld [vmem:[%s2030_s3] sm:$0xff] (!%p218_p10) }
   0xf   : > { %221 = sbr.rel (%p218_p10) target bundleno = 457 (0x1c9), region = 36  ;;  %v298_v2 = vunpack.c.l.s4 (!%p218_p10), %v1689_v1  ;;  %381 = vmatprep.mubr.bf16.mxu0 (!%p218_p10), %v1690_v10  ;;  %422 = vmatprep.mubr.bf16.mxu1 (!%p218_p10), %v1690_v10  ;;  %s1692_s13 = smov (!%p218_p10), 126   ;;  %vm327_vm0 = vcmask (!%p218_p10), 1039360   ;;  %vm336_vm1 = vcmask (!%p218_p10), 1041408   ;;  %v1487_v24 = vld [vmem:[%s2029_s2 + $0x4] sm:$0xf] (!%p218_p10) }
  0x10   : > { %v301_v3 = vshrl.u32 (!%p218_p10), %v300_v0, 7  ;;  %1607 = vset.pattern.permute.xlu0 (!%p218_p10), %v1690_v10  ;;  %s1693_s14 = smov (!%p218_p10), 110   ;;  %s1694_s21 = smov (!%p218_p10), 109   ;;  %vm332_vm2 = vcmask (!%p218_p10), 31744   ;;  %vm540_vm3 = vcmask (!%p218_p10), 1031168   ;;  %vm658_vm4 = vcmask (!%p218_p10), 900096  }
  0x11   : > { %v299_v4 = vunpack.c.0.s8 (!%p218_p10), %v298_v2  ;;  %s1695_s22 = smov (!%p218_p10), 108   ;;  %s1696_s24 = smov (!%p218_p10), 92   ;;  %v313_v36 = vld [vmem:[%s2029_s2] sm:$0xf] (!%p218_p10)  ;;  %v1496_v47 = vld [vmem:[%s2029_s2 + $0x8] sm:$0xf] (!%p218_p10) }
  0x12   : > { %s1697_s26 = smov (!%p218_p10), 91   ;;  %vm776_vm5 = vcmask (!%p218_p10), 891904   ;;  %v1501_v58 = vld [vmem:[%s2029_s2 + $0xc] sm:$0xf] (!%p218_p10)  ;;  %vm894_vm6 = vcmask (!%p218_p10), 883712   ;;  %vm1012_vm7 = vcmask (!%p218_p10), 752640  }
  0x13   : > { %v302_v5 = vsub.s32 (!%p218_p10), %v299_v4, %v301_v3  ;;  %v1506_v4 = vld [vmem:[%s2029_s2 + $0x10] sm:$0xf] (!%p218_p10)  ;;  %vm1130_vm8 = vcmask (!%p218_p10), 744448   ;;  %vm1248_vm9 = vcmask (!%p218_p10), 736256  }
  0x16   : > { %s267_s29 = scalar_select %p266_p11, %s1679_s18, 1 }
  0x18   : > { %s1539_s30 = smul.u32 10, %s267_s29  ;;  %s1698_s29 = smov 90  }
  0x1a   : > { %s1537_s5 = sadd.s32 8, %s1539_s30  ;;  %s273_s8 = scalar_lea.vmem %s2027_s0, %s1539_s30 }
  0x1b   : > { %s288_s11 = scalar_lea.vmem %s2028_s1, %s1537_s5  ;;  %v293_v6 = vld [vmem:[%s273_s8] sm:$0xff]  ;;  %s258_s8 = sand.u32 1, %s1671_s16  }
  0x1c   : > { %v294_v7 = vld [vmem:[%s288_s11] sm:$0x3]  ;;  %v296_v8 = vcombine.high %v293_v6, %v293_v6  ;;  %v1788_v9 = vrot.slane %v293_v6, %v302_v5  ;;  %s1484_s9 = sshll.u32 %s258_s8, 5  ;;  %s1538_s11 = sshll.u32 %s1679_s18, 9 }
  0x1d   : > { %325 = vrot.lane.b32.xlu0 %v294_v7, %s1691_s12  ;;  %s260_s10 = scalar_lea.vmem [#allocation2], %s1484_s9  ;;  %s1369_s18 = scalar_lea.sflag [#allocation3], %s258_s8 }
  0x1e   : > { %v1792_v11 = vrot.slane %v296_v8, %v302_v5  ;;  %530 = vrot.lane.b32.xlu1 %v1788_v9, %s1692_s13  ;;  %v1799_v12 = vcombine.high %v1788_v9, %v1788_v9  ;;  %v435_v26 = vsel %vm336_vm1, %v1788_v9, 0 }
  0x20   : > { %v1806_v13 = vcombine.high %v1792_v11, %v1792_v11  ;;  %v441_v34 = vsel %vm336_vm1, %v1792_v11, 0 }
  0x21   : > { %317 = vrot.lane.b32.xlu0 %v1788_v9, %s1691_s12 }
  0x22   : > { %321 = vrot.lane.b32.xlu1 %v1792_v11, %s1691_s12 }
  0x25   : > { %319 = vrot.lane.b32.xlu0 %v1799_v12, %s1691_s12 }
  0x26   : > { %534 = vrot.lane.b32.xlu1 %v1792_v11, %s1692_s13 }
  0x29   : > { %532 = vrot.lane.b32.xlu0 %v1799_v12, %s1692_s13 }
  0x2a   : > { %323 = vrot.lane.b32.xlu1 %v1806_v13, %s1691_s12  ;;  %s1385_s12 = sshll.u32 %s260_s10, 4  ;;  %s1980_s12 = int_to_ptr.vmem [resolvable:$true] %s1385_s12 }
  0x2d   : > { %536 = vrot.lane.b32.xlu0 %v1806_v13, %s1692_s13 }
  0x2e   : > { %538 = vrot.lane.b32.xlu1 %v294_v7, %s1692_s13 }
  0x31   : > { %648 = vrot.lane.b32.xlu0 %v1788_v9, %s1693_s14 }
  0x32   : > { %650 = vrot.lane.b32.xlu1 %v1799_v12, %s1693_s14 }
  0x35   : > { %652 = vrot.lane.b32.xlu0 %v1792_v11, %s1693_s14 }
  0x36   : > { %654 = vrot.lane.b32.xlu1 %v1806_v13, %s1693_s14 }
  0x39   : > { %656 = vrot.lane.b32.xlu0 %v294_v7, %s1693_s14 }
  0x3a   : > { %766 = vrot.lane.b32.xlu1 %v1788_v9, %s1694_s21 }
  0x3d   : > { %768 = vrot.lane.b32.xlu0 %v1799_v12, %s1694_s21 }
  0x3e   : > { %770 = vrot.lane.b32.xlu1 %v1792_v11, %s1694_s21 }
  0x41   : > { %772 = vrot.lane.b32.xlu0 %v1806_v13, %s1694_s21 }
  0x42   : > { %774 = vrot.lane.b32.xlu1 %v294_v7, %s1694_s21  ;;  %s1978_s21 = scalar_lea.hbm %s2031_s4, %s1538_s11 }
  0x45   : > { %884 = vrot.lane.b32.xlu0 %v1788_v9, %s1695_s22 }
  0x46   : > { %886 = vrot.lane.b32.xlu1 %v1799_v12, %s1695_s22 }
  0x49   : > { %888 = vrot.lane.b32.xlu0 %v1792_v11, %s1695_s22 }
  0x4a   : > { %890 = vrot.lane.b32.xlu1 %v1806_v13, %s1695_s22 }
  0x4d   : > { %892 = vrot.lane.b32.xlu0 %v294_v7, %s1695_s22  ;;  %s1609_s22 = scalar_lea.vmem %s1980_s12, 512 }
  0x4e   : > { %1002 = vrot.lane.b32.xlu1 %v1788_v9, %s1696_s24  ;;  %p1610_p12 = scmp.ne.s32.totalorder %s1980_s12, %s1609_s22 }
  0x50   : > { %p1611_p13 = pnand %p1610_p12, %p1765_p4 }
  0x51   : > { %1004 = vrot.lane.b32.xlu0 %v1799_v12, %s1696_s24 }
  0x52   : > { %1006 = vrot.lane.b32.xlu1 %v1792_v11, %s1696_s24  ;;  %p1612_p0 = pneg %p1611_p13 }
  0x55   : > { %1008 = vrot.lane.b32.xlu0 %v1806_v13, %s1696_s24 }
  0x56   : > { %1010 = vrot.lane.b32.xlu1 %v294_v7, %s1696_s24  ;;  %s1699_s24 = smov [#allocation2]  }
  0x59   : > { %1120 = vrot.lane.b32.xlu0 %v1788_v9, %s1697_s26 }
  0x5a   : > { %1122 = vrot.lane.b32.xlu1 %v1799_v12, %s1697_s26 }
  0x5d   : > { %1124 = vrot.lane.b32.xlu0 %v1792_v11, %s1697_s26 }
  0x5e   : > { %1126 = vrot.lane.b32.xlu1 %v1806_v13, %s1697_s26 }
  0x61   : > { %1128 = vrot.lane.b32.xlu0 %v294_v7, %s1697_s26  ;;  %s1613_s26 = sshll.u32 %s1699_s24, 4  ;;  %s1614_s26 = int_to_ptr.vmem [resolvable:$false] %s1613_s26 }
  0x62   : > { %1238 = vrot.lane.b32.xlu1 %v1788_v9, %s1698_s29  ;;  %p1616_p1 = scmp.lt.s32.totalorder %s1980_s12, %s1614_s26 }
  0x65   : > { %1240 = vrot.lane.b32.xlu0 %v1799_v12, %s1698_s29 }
  0x66   : > { %1242 = vrot.lane.b32.xlu1 %v1792_v11, %s1698_s29 }
  0x69   : > { %1244 = vrot.lane.b32.xlu0 %v1806_v13, %s1698_s29 }
  0x6a   : > { %1246 = vrot.lane.b32.xlu1 %v294_v7, %s1698_s29  ;;  %s1615_s29 = scalar_lea.vmem %s1614_s26, 1024 }
  0x6b   : > { %p1617_p2 = scmp.lt.s32.totalorder %s1615_s29, %s1609_s22 }
  0x6d   : > { %1357 = vperm.xlu0 %1607, %v1354_v14   ;;  %p1618_p3 = por %p1617_p2, %p1616_p1 }
  0x6f   : > { %p1619_p5 = pnand %p1618_p3, %p1612_p0 }
  0x8f   : > { %v326_v15 = vpop.permute.xlu0 %325 }
  0x90   : > { %v531_v16 = vpop.permute.xlu1 %530 }
  0x93   : > { %v318_v17 = vpop.permute.xlu0 %317 }
  0x94   : > { %v322_v18 = vpop.permute.xlu1 %321 }
  0x97   : > { %v320_v19 = vpop.permute.xlu0 %319 }
  0x98   : > { %v535_v20 = vpop.permute.xlu1 %534  ;;  %v329_v21 = vsel %vm327_vm0, %v320_v19, %v322_v18  ;;  %v328_v22 = vsel %vm327_vm0, %v318_v17, %v320_v19 }
  0x99   : > { %1488 = vmatprep.subr.msk.bf16.mxu0 %vm336_vm1, %v329_v21  ;;  %v338_v23 = vsel %vm336_vm1, %v328_v22, 0 }
  0x9a   : > { %350 = vmatpush1.bf16.msra.mxu0 %v338_v23 }
  0x9b   : > { %v533_v25 = vpop.permute.xlu0 %532  ;;  %1492 = vmatprep.subr.msk.bf16.mxu0 %vm336_vm1, %v1799_v12 }
  0x9c   : > { %v324_v27 = vpop.permute.xlu1 %323  ;;  %v542_v30 = vsel %vm540_vm3, %v533_v25, %v535_v20  ;;  %v541_v35 = vsel %vm540_vm3, %v531_v16, %v533_v25 }
  0x9d   : > { %1489 = vmatmul.mubr.msk.bf16.vlgmr.msra.gmra.mrb[0].mxu0 %vm332_vm2, %v1487_v24  ;;  %v331_v28 = vsel %vm327_vm0, %v324_v27, %v326_v15  ;;  %v330_v29 = vsel %vm327_vm0, %v322_v18, %v324_v27  ;;  %v549_v40 = vsel %vm336_vm1, %v541_v35, 0  ;;  %v1511_v15 = vld [vmem:[%s2029_s2 + $0x14] sm:$0xf]  ;;  %v1521_v35 = vld [vmem:[%s2029_s2 + $0x1c] sm:$0xf] }
  0x9e   : > { %1490 = vmatprep.subr.msk.bf16.mxu1 %vm336_vm1, %v331_v28  ;;  %447 = vmatpush1.bf16.msra.mxu0 %v435_v26  ;;  %v344_v31 = vsel %vm336_vm1, %v330_v29, 0  ;;  %v1516_v26 = vld [vmem:[%s2029_s2 + $0x18] sm:$0xf] }
  0x9f   : > { %1497 = vmatprep.subr.msk.bf16.mxu0 %vm336_vm1, %v542_v30  ;;  %v537_v32 = vpop.permute.xlu0 %536  ;;  %391 = vmatpush1.bf16.msra.mxu1 %v344_v31 }
  0xa0   : > { %v539_v33 = vpop.permute.xlu1 %538  ;;  %1494 = vmatprep.subr.msk.bf16.mxu1 %vm336_vm1, %v1806_v13  ;;  %478 = vmatprep.mubr.bf16.mxu0 %v1690_v10  ;;  %v543_v41 = vsel %vm540_vm3, %v535_v20, %v537_v32 }
  0xa1   : > { %v544_v37 = vsel %vm540_vm3, %v537_v32, %v539_v33  ;;  %v555_v45 = vsel %vm336_vm1, %v543_v41, 0 }
  0xa2   : > { %1491 = vmatmul.mubr.msk.bf16.vlgmr.msra.gmra.mrb[0].mxu1 %vm332_vm2, %v1487_v24 }
  0xa3   : > { %v649_v38 = vpop.permute.xlu0 %648  ;;  %488 = vmatpush1.bf16.msra.mxu1 %v441_v34  ;;  %519 = vmatprep.mubr.bf16.mxu1 %v1690_v10 }
  0xa4   : > { %1499 = vmatprep.subr.msk.bf16.mxu1 %vm336_vm1, %v544_v37  ;;  %v651_v39 = vpop.permute.xlu1 %650 }
  0xa5   : > { %1493 = vmatmul.mubr.msk.bf16.vlgmr.msra.gmra.mrb[4].mxu0 %vm332_vm2, %v313_v36  ;;  %v659_v46 = vsel %vm658_vm4, %v649_v38, %v651_v39 }
  0xa6   : > { %561 = vmatpush1.bf16.msra.mxu0 %v549_v40  ;;  %592 = vmatprep.mubr.bf16.mxu0 %v1690_v10  ;;  %v667_v51 = vsel %vm336_vm1, %v659_v46, 0  ;;  %v1526_v46 = vld [vmem:[%s2029_s2 + $0x20] sm:$0xf] }
  0xa7   : > { %v653_v42 = vpop.permute.xlu0 %652 }
  0xa8   : > { %v660_v43 = vsel %vm658_vm4, %v651_v39, %v653_v42  ;;  %v655_v44 = vpop.permute.xlu1 %654 }
  0xa9   : > { %1502 = vmatprep.subr.msk.bf16.mxu0 %vm336_vm1, %v660_v43  ;;  %v661_v52 = vsel %vm658_vm4, %v653_v42, %v655_v44 }
  0xaa   : > { %1495 = vmatmul.mubr.msk.bf16.vlgmr.msra.gmra.mrb[4].mxu1 %vm332_vm2, %v313_v36  ;;  %v673_v56 = vsel %vm336_vm1, %v661_v52, 0 }
  0xab   : > { %602 = vmatpush1.bf16.msra.mxu1 %v555_v45  ;;  %v657_v48 = vpop.permute.xlu0 %656  ;;  %633 = vmatprep.mubr.bf16.mxu1 %v1690_v10 }
  0xac   : > { %v662_v49 = vsel %vm658_vm4, %v655_v44, %v657_v48  ;;  %v767_v50 = vpop.permute.xlu1 %766 }
  0xad   : > { %1498 = vmatmul.mubr.msk.bf16.vlgmr.msra.gmra.mrb[8].mxu0 %vm332_vm2, %v1496_v47  ;;  %1504 = vmatprep.subr.msk.bf16.mxu1 %vm336_vm1, %v662_v49 }
  0xae   : > { %679 = vmatpush1.bf16.msra.mxu0 %v667_v51  ;;  %710 = vmatprep.mubr.bf16.mxu0 %v1690_v10 }
  0xaf   : > { %v769_v53 = vpop.permute.xlu0 %768 }
  0xb0   : > { %v771_v54 = vpop.permute.xlu1 %770  ;;  %v777_v57 = vsel %vm776_vm5, %v767_v50, %v769_v53 }
  0xb1   : > { %v778_v55 = vsel %vm776_vm5, %v769_v53, %v771_v54  ;;  %v785_v61 = vsel %vm336_vm1, %v777_v57, 0 }
  0xb2   : > { %1500 = vmatmul.mubr.msk.bf16.vlgmr.msra.gmra.mrb[8].mxu1 %vm332_vm2, %v1496_v47  ;;  %1507 = vmatprep.subr.msk.bf16.mxu0 %vm336_vm1, %v778_v55 }
  0xb3   : > { %720 = vmatpush1.bf16.msra.mxu1 %v673_v56  ;;  %v773_v59 = vpop.permute.xlu0 %772  ;;  %751 = vmatprep.mubr.bf16.mxu1 %v1690_v10 }
  0xb4   : > { %v775_v60 = vpop.permute.xlu1 %774  ;;  %v779_v63 = vsel %vm776_vm5, %v771_v54, %v773_v59 }
  0xb5   : > { %v780_v62 = vsel %vm776_vm5, %v773_v59, %v775_v60  ;;  %1503 = vmatmul.mubr.msk.bf16.vlgmr.msra.gmra.mrb[12].mxu0 %vm332_vm2, %v1501_v58  ;;  %v791_v2 = vsel %vm336_vm1, %v779_v63, 0 }
  0xb6   : > { %797 = vmatpush1.bf16.msra.mxu0 %v785_v61  ;;  %1509 = vmatprep.subr.msk.bf16.mxu1 %vm336_vm1, %v780_v62 }
  0xb7   : > { %v885_v0 = vpop.permute.xlu0 %884  ;;  %828 = vmatprep.mubr.bf16.mxu0 %v1690_v10 }
  0xb8   : > { %v887_v1 = vpop.permute.xlu1 %886 }
  0xb9   : > { %v895_v3 = vsel %vm894_vm6, %v885_v0, %v887_v1 }
  0xba   : > { %1505 = vmatmul.mubr.msk.bf16.vlgmr.msra.gmra.mrb[12].mxu1 %vm332_vm2, %v1501_v58  ;;  %v903_v8 = vsel %vm336_vm1, %v895_v3, 0 }
  0xbb   : > { %838 = vmatpush1.bf16.msra.mxu1 %v791_v2  ;;  %v889_v5 = vpop.permute.xlu0 %888  ;;  %869 = vmatprep.mubr.bf16.mxu1 %v1690_v10 }
  0xbc   : > { %v896_v6 = vsel %vm894_vm6, %v887_v1, %v889_v5  ;;  %v891_v7 = vpop.permute.xlu1 %890 }
  0xbd   : > { %1508 = vmatmul.mubr.msk.bf16.vlgmr.msra.gmra.mrb[16].mxu0 %vm332_vm2, %v1506_v4  ;;  %1512 = vmatprep.subr.msk.bf16.mxu0 %vm336_vm1, %v896_v6  ;;  %v897_v9 = vsel %vm894_vm6, %v889_v5, %v891_v7 }
  0xbe   : > { %915 = vmatpush1.bf16.msra.mxu0 %v903_v8  ;;  %946 = vmatprep.mubr.bf16.mxu0 %v1690_v10  ;;  %v909_v14 = vsel %vm336_vm1, %v897_v9, 0 }
  0xbf   : > { %v893_v11 = vpop.permute.xlu0 %892 }
  0xc0   : > { %v898_v12 = vsel %vm894_vm6, %v891_v7, %v893_v11  ;;  %v1003_v13 = vpop.permute.xlu1 %1002 }
  0xc1   : > { %1514 = vmatprep.subr.msk.bf16.mxu1 %vm336_vm1, %v898_v12 }
  0xc2   : > { %1510 = vmatmul.mubr.msk.bf16.vlgmr.msra.gmra.mrb[16].mxu1 %vm332_vm2, %v1506_v4 }
  0xc3   : > { %956 = vmatpush1.bf16.msra.mxu1 %v909_v14  ;;  %v1005_v16 = vpop.permute.xlu0 %1004  ;;  %987 = vmatprep.mubr.bf16.mxu1 %v1690_v10 }
  0xc4   : > { %v1013_v17 = vsel %vm1012_vm7, %v1003_v13, %v1005_v16  ;;  %v1007_v18 = vpop.permute.xlu1 %1006 }
  0xc5   : > { %v1021_v19 = vsel %vm336_vm1, %v1013_v17, 0  ;;  %v1014_v20 = vsel %vm1012_vm7, %v1005_v16, %v1007_v18  ;;  %1513 = vmatmul.mubr.msk.bf16.vlgmr.msra.gmra.mrb[20].mxu0 %vm332_vm2, %v1511_v15 }
  0xc6   : > { %1517 = vmatprep.subr.msk.bf16.mxu0 %vm336_vm1, %v1014_v20  ;;  %1064 = vmatprep.mubr.bf16.mxu0 %v1690_v10 }
  0xc7   : > { %v1009_v21 = vpop.permute.xlu0 %1008  ;;  %1033 = vmatpush1.bf16.msra.mxu0 %v1021_v19 }
  0xc8   : > { %v1015_v22 = vsel %vm1012_vm7, %v1007_v18, %v1009_v21  ;;  %v1011_v23 = vpop.permute.xlu1 %1010 }
  0xc9   : > { %v1027_v24 = vsel %vm336_vm1, %v1015_v22, 0  ;;  %v1016_v25 = vsel %vm1012_vm7, %v1009_v21, %v1011_v23 }
  0xca   : > { %1515 = vmatmul.mubr.msk.bf16.vlgmr.msra.gmra.mrb[20].mxu1 %vm332_vm2, %v1511_v15  ;;  %1519 = vmatprep.subr.msk.bf16.mxu1 %vm336_vm1, %v1016_v25 }
  0xcb   : > { %v1121_v27 = vpop.permute.xlu0 %1120  ;;  %1074 = vmatpush1.bf16.msra.mxu1 %v1027_v24  ;;  %1105 = vmatprep.mubr.bf16.mxu1 %v1690_v10 }
  0xcc   : > { %v1123_v28 = vpop.permute.xlu1 %1122 }
  0xcd   : > { %1518 = vmatmul.mubr.msk.bf16.vlgmr.msra.gmra.mrb[24].mxu0 %vm332_vm2, %v1516_v26  ;;  %v1131_v29 = vsel %vm1130_vm8, %v1121_v27, %v1123_v28 }
  0xce   : > { %1182 = vmatprep.mubr.bf16.mxu0 %v1690_v10  ;;  %v1139_v33 = vsel %vm336_vm1, %v1131_v29, 0 }
  0xcf   : > { %v1125_v30 = vpop.permute.xlu0 %1124 }
  0xd0   : > { %v1132_v31 = vsel %vm1130_vm8, %v1123_v28, %v1125_v30  ;;  %v1127_v32 = vpop.permute.xlu1 %1126 }
  0xd1   : > { %1522 = vmatprep.subr.msk.bf16.mxu0 %vm336_vm1, %v1132_v31  ;;  %v1133_v34 = vsel %vm1130_vm8, %v1125_v30, %v1127_v32 }
  0xd2   : > { %1520 = vmatmul.mubr.msk.bf16.vlgmr.msra.gmra.mrb[24].mxu1 %vm332_vm2, %v1516_v26  ;;  %1151 = vmatpush1.bf16.msra.mxu0 %v1139_v33  ;;  %v1145_v39 = vsel %vm336_vm1, %v1133_v34, 0 }
  0xd3   : > { %v1129_v36 = vpop.permute.xlu0 %1128  ;;  %1223 = vmatprep.mubr.bf16.mxu1 %v1690_v10 }
  0xd4   : > { %v1134_v37 = vsel %vm1130_vm8, %v1127_v32, %v1129_v36  ;;  %v1239_v38 = vpop.permute.xlu1 %1238 }
  0xd5   : > { %1523 = vmatmul.mubr.msk.bf16.vlgmr.msra.gmra.mrb[28].mxu0 %vm332_vm2, %v1521_v35  ;;  %1524 = vmatprep.subr.msk.bf16.mxu1 %vm336_vm1, %v1134_v37 }
  0xd6   : > { %1192 = vmatpush1.bf16.msra.mxu1 %v1145_v39  ;;  %1300 = vmatprep.mubr.bf16.mxu0 %v1690_v10 }
  0xd7   : > { %v1241_v40 = vpop.permute.xlu0 %1240 }
  0xd8   : > { %v1249_v41 = vsel %vm1248_vm9, %v1239_v38, %v1241_v40  ;;  %v1243_v42 = vpop.permute.xlu1 %1242 }
  0xd9   : > { %v1257_v43 = vsel %vm336_vm1, %v1249_v41, 0  ;;  %v1250_v44 = vsel %vm1248_vm9, %v1241_v40, %v1243_v42 }
  0xda   : > { %1525 = vmatmul.mubr.msk.bf16.vlgmr.msra.gmra.mrb[28].mxu1 %vm332_vm2, %v1521_v35  ;;  %1527 = vmatprep.subr.msk.bf16.mxu0 %vm336_vm1, %v1250_v44 }
  0xdb   : > { %v1245_v45 = vpop.permute.xlu0 %1244  ;;  %1269 = vmatpush1.bf16.msra.mxu0 %v1257_v43  ;;  %1341 = vmatprep.mubr.bf16.mxu1 %v1690_v10 }
  0xdc   : > { %v1251_v47 = vsel %vm1248_vm9, %v1243_v42, %v1245_v45  ;;  %v1247_v48 = vpop.permute.xlu1 %1246 }
  0xdd   : > { %v1263_v49 = vsel %vm336_vm1, %v1251_v47, 0  ;;  %v1252_v50 = vsel %vm1248_vm9, %v1245_v45, %v1247_v48 }
  0xde   : > { %1528 = vmatmul.mubr.msk.bf16.vlgmr.msra.gmra.mrb[32].mxu0 %vm332_vm2, %v1526_v46  ;;  %1529 = vmatprep.subr.msk.bf16.mxu1 %vm336_vm1, %v1252_v50 }
  0xdf   : > { %1310 = vmatpush1.bf16.msra.mxu1 %v1263_v49 }
  0xe2   : > { %1530 = vmatmul.mubr.msk.bf16.vlgmr.msra.gmra.mrb[32].mxu1 %vm332_vm2, %v1526_v46 }
 0x170   : > { %v383_v51 = vpop.f32.mrb[0].mxu0 }
 0x171   : > { %v385_v52 = vpop.f32.mrb[1].mxu0 }
 0x172   : > { %v387_v53 = vpop.f32.mrb[2].mxu0 }
 0x173   : > { %v388_v54 = vpop.f32.mrb[3].mxu0 }
 0x175   : > { %v424_v55 = vpop.f32.mrb[0].mxu1 }
 0x176   : > { %v426_v10 = vpop.f32.mrb[1].mxu1 }
 0x177   : > { %v428_v56 = vpop.f32.mrb[2].mxu1 }
 0x178   : > { %v480_v57 = vpop.f32.mrb[4].mxu0  ;;  %v429_v58 = vpop.f32.mrb[3].mxu1 }
 0x179   : > { %v481_v59 = vadd.f32 %v480_v57, %v383_v51  ;;  %v482_v60 = vpop.f32.mrb[5].mxu0 }
 0x17a   : > { %v483_v61 = vadd.f32 %v482_v60, %v385_v52  ;;  %v484_v62 = vpop.f32.mrb[6].mxu0 }
 0x17b   : > { %v485_v63 = vpop.f32.mrb[7].mxu0 }
 0x17d   : > { %v521_v0 = vpop.f32.mrb[4].mxu1 }
 0x17e   : > { %v522_v1 = vadd.f32 %v521_v0, %v424_v55  ;;  %v523_v2 = vpop.f32.mrb[5].mxu1 }
 0x17f   : > { %v524_v3 = vadd.f32 %v523_v2, %v426_v10  ;;  %v525_v4 = vpop.f32.mrb[6].mxu1 }
 0x180   : > { %v594_v5 = vpop.f32.mrb[8].mxu0  ;;  %v526_v6 = vpop.f32.mrb[7].mxu1 }
 0x181   : > { %v642_v7 = vadd.f32 %v594_v5, %v481_v59  ;;  %v596_v8 = vpop.f32.mrb[9].mxu0 }
 0x182   : > { %v643_v9 = vadd.f32 %v596_v8, %v483_v61  ;;  %v598_v11 = vpop.f32.mrb[10].mxu0 }
 0x183   : > { %v599_v12 = vpop.f32.mrb[11].mxu0 }
 0x185   : > { %v635_v13 = vpop.f32.mrb[8].mxu1 }
 0x186   : > { %v644_v14 = vadd.f32 %v635_v13, %v522_v1  ;;  %v637_v15 = vpop.f32.mrb[9].mxu1 }
 0x187   : > { %v645_v16 = vadd.f32 %v637_v15, %v524_v3  ;;  %v639_v17 = vpop.f32.mrb[10].mxu1 }
 0x188   : > { %v712_v18 = vpop.f32.mrb[12].mxu0  ;;  %v640_v19 = vpop.f32.mrb[11].mxu1 }
 0x189   : > { %v760_v20 = vadd.f32 %v712_v18, %v642_v7  ;;  %v714_v21 = vpop.f32.mrb[13].mxu0 }
 0x18a   : > { %v761_v22 = vadd.f32 %v714_v21, %v643_v9  ;;  %v716_v23 = vpop.f32.mrb[14].mxu0 }
 0x18b   : > { %v717_v24 = vpop.f32.mrb[15].mxu0 }
 0x18d   : > { %v753_v25 = vpop.f32.mrb[12].mxu1 }
 0x18e   : > { %v762_v26 = vadd.f32 %v753_v25, %v644_v14  ;;  %v755_v27 = vpop.f32.mrb[13].mxu1 }
 0x18f   : > { %v763_v28 = vadd.f32 %v755_v27, %v645_v16  ;;  %v757_v29 = vpop.f32.mrb[14].mxu1  ;;  %v1358_v16 = vpop.permute.xlu0 %1357 }
 0x190   : > { %v830_v30 = vpop.f32.mrb[16].mxu0  ;;  %v758_v31 = vpop.f32.mrb[15].mxu1 }
 0x191   : > { %v878_v32 = vadd.f32 %v830_v30, %v760_v20  ;;  %v832_v33 = vpop.f32.mrb[17].mxu0 }
 0x192   : > { %v879_v34 = vadd.f32 %v832_v33, %v761_v22  ;;  %v834_v35 = vpop.f32.mrb[18].mxu0 }
 0x193   : > { %v835_v36 = vpop.f32.mrb[19].mxu0 }
 0x195   : > { %v871_v37 = vpop.f32.mrb[16].mxu1 }
 0x196   : > { %v880_v38 = vadd.f32 %v871_v37, %v762_v26  ;;  %v873_v39 = vpop.f32.mrb[17].mxu1 }
 0x197   : > { %v881_v40 = vadd.f32 %v873_v39, %v763_v28  ;;  %v875_v41 = vpop.f32.mrb[18].mxu1 }
 0x198   : > { %v948_v42 = vpop.f32.mrb[20].mxu0  ;;  %v876_v43 = vpop.f32.mrb[19].mxu1 }
 0x199   : > { %v996_v44 = vadd.f32 %v948_v42, %v878_v32  ;;  %v950_v45 = vpop.f32.mrb[21].mxu0 }
 0x19a   : > { %v997_v46 = vadd.f32 %v950_v45, %v879_v34  ;;  %v952_v47 = vpop.f32.mrb[22].mxu0 }
 0x19b   : > { %v953_v48 = vpop.f32.mrb[23].mxu0 }
 0x19d   : > { %v989_v49 = vpop.f32.mrb[20].mxu1 }
 0x19e   : > { %v998_v50 = vadd.f32 %v989_v49, %v880_v38  ;;  %v991_v51 = vpop.f32.mrb[21].mxu1 }
 0x19f   : > { %v999_v52 = vadd.f32 %v991_v51, %v881_v40  ;;  %v993_v53 = vpop.f32.mrb[22].mxu1 }
 0x1a0   : > { %v1066_v54 = vpop.f32.mrb[24].mxu0  ;;  %v994_v55 = vpop.f32.mrb[23].mxu1 }
 0x1a1   : > { %v1114_v10 = vadd.f32 %v1066_v54, %v996_v44  ;;  %v1068_v56 = vpop.f32.mrb[25].mxu0 }
 0x1a2   : > { %v1115_v57 = vadd.f32 %v1068_v56, %v997_v46  ;;  %v1070_v58 = vpop.f32.mrb[26].mxu0 }
 0x1a3   : > { %v1071_v59 = vpop.f32.mrb[27].mxu0 }
 0x1a5   : > { %v1107_v60 = vpop.f32.mrb[24].mxu1 }
 0x1a6   : > { %v1116_v61 = vadd.f32 %v1107_v60, %v998_v50  ;;  %v1109_v62 = vpop.f32.mrb[25].mxu1 }
 0x1a7   : > { %v1117_v63 = vadd.f32 %v1109_v62, %v999_v52  ;;  %v1111_v0 = vpop.f32.mrb[26].mxu1 }
 0x1a8   : > { %v1184_v1 = vpop.f32.mrb[28].mxu0  ;;  %v1112_v2 = vpop.f32.mrb[27].mxu1 }
 0x1a9   : > { %v1232_v3 = vadd.f32 %v1184_v1, %v1114_v10  ;;  %v1186_v4 = vpop.f32.mrb[29].mxu0 }
 0x1aa   : > { %v1233_v5 = vadd.f32 %v1186_v4, %v1115_v57  ;;  %v1188_v6 = vpop.f32.mrb[30].mxu0 }
 0x1ab   : > { %v1189_v7 = vpop.f32.mrb[31].mxu0 }
 0x1ad   : > { %v1225_v8 = vpop.f32.mrb[28].mxu1 }
 0x1ae   : > { %v1234_v9 = vadd.f32 %v1225_v8, %v1116_v61  ;;  %v1227_v11 = vpop.f32.mrb[29].mxu1 }
 0x1af   : > { %v1235_v12 = vadd.f32 %v1227_v11, %v1117_v63  ;;  %v1229_v13 = vpop.f32.mrb[30].mxu1 }
 0x1b0   : > { %v1230_v14 = vpop.f32.mrb[31].mxu1 }
 0x1b1   : > { %v1302_v15 = vpop.f32.mrb[32].mxu0 }
 0x1b2   : > { %v1350_v17 = vadd.f32 %v1302_v15, %v1232_v3  ;;  %v1304_v18 = vpop.f32.mrb[33].mxu0 }
 0x1b3   : > { %v1351_v19 = vadd.f32 %v1304_v18, %v1233_v5  ;;  %v1306_v20 = vpop.f32.mrb[34].mxu0 }
 0x1b4   : > { %v1360_v21 = vadd.f32 %v1358_v16, %v1350_v17  ;;  %v1307_v22 = vpop.f32.mrb[35].mxu0 }
 0x1b5   : > { %v1361_v23 = vadd.f32 %v1358_v16, %v1351_v19  ;;  %v1343_v24 = vpop.f32.mrb[32].mxu1 }
 0x1b6   : > { %1364 = vst [vmem:[%s260_s10] sm:$0xff] %v1360_v21  ;;  %v1352_v25 = vadd.f32 %v1343_v24, %v1234_v9  ;;  %v1345_v26 = vpop.f32.mrb[33].mxu1 }
 0x1b7   : > { %1365 = vst [vmem:[%s260_s10 + $0x8] sm:$0xff] %v1361_v23  ;;  %v1353_v27 = vadd.f32 %v1345_v26, %v1235_v12  ;;  %v1347_v28 = vpop.f32.mrb[34].mxu1 }
 0x1b8   : > { %v1362_v29 = vadd.f32 %v1358_v16, %v1352_v25  ;;  %v1348_v30 = vpop.f32.mrb[35].mxu1 }
 0x1b9   : > { %v1363_v31 = vadd.f32 %v1358_v16, %v1353_v27 }
 0x1ba   : > { %1366 = vst [vmem:[%s260_s10 + $0x10] sm:$0xff] %v1362_v29 }
 0x1bb   : > { %1367 = vst [vmem:[%s260_s10 + $0x18] sm:$0xff] %v1363_v31 }
 0x1bc   : > { %1622 = shalt.err (!%p1619_p5)
}
 0x1bd   : > { %s1623_s30 = scalar_lea.hbm %s1978_s21, 512  ;;  %s1627_s7 = scalar_lea.hbm %s2031_s4, 1024 }
 0x1be   : > { %p1624_p6 = scmp.ne.s32.totalorder %s1978_s21, %s1623_s30  ;;  %p1628_p10 = scmp.lt.u32.totalorder %s1978_s21, %s2031_s4 }
 0x1bf   : > { %p1629_p11 = scmp.lt.u32.totalorder %s1627_s7, %s1623_s30  ;;  %p1631_p13 = scmp.lt.u32.totalorder %s1623_s30, %s1978_s21 }
 0x1c0   : > { %p1625_p7 = pnand %p1624_p6, %p1765_p4 }
 0x1c1   : > { %p1630_p12 = por %p1629_p11, %p1628_p10 }
 0x1c2   : > { %p1626_p9 = pneg %p1625_p7 }
 0x1c3   : > { %p1632_p0 = por %p1631_p13, %p1630_p12 }
 0x1c5   : > { %p1633_p1 = pnand %p1632_p0, %p1626_p9 }
 0x1c7   : > { %1636 = shalt.err (!%p1633_p1)
}
 0x1c8   : > { %1541 = dma.vmem_to_hbm [thread:$0]  (%p1765_p4), %s1980_s12, 512, %s1978_s21, %s1369_s18  }
 0x1c9 PF: > { %p1548_p2 = scmp.ge.s32.totalorder %s1687_s20, 2  ;;  %s1397_s10 = sand.u32 1, %s1667_s15  }
 0x1ca   : > { %s1398_s11 = scalar_lea.sflag [#allocation3], %s1397_s10 }
 0x1cb   : > { %p1544_p3 = pnand %p1548_p2, %p1772_p8 }
 0x1cd   : > { %1662 = dma.done.wait (!%p1544_p3), %s1398_s11, 512  }
 0x1ce   : > { %1664 = vsyncadd (!%p1544_p3), %s1398_s11, 4294966784  ;;  %s17_s20 = sadd.s32 1, %s1687_s20   ;;  %s2034_s15 = smov %s1671_s16 }
 0x1cf   : > { %p14_p5 = scmp.ge.s32.totalorder %s17_s20, 4   ;;  %s2035_s16 = smov %s1675_s17 }
 0x1d0   : > { %s2036_s17 = smov %s1778_s28  ;;  %s2037_s18 = smov %s1683_s19 }
 0x1d1   : > { %s2038_s19 = smov %s2040_s23  ;;  %16 = sbr.rel (!%p14_p5) target bundleno = 4 (0x4), region = 82 }
 0x1d8   :  { %1403 = vsyncpa [#allocation3], 1 }
 0x1d9   :  { %1405 = vsyncpa [#allocation3 + $0x1], 1 }

</bundles_post_ra>
